<compile_context>
chip_gen: v6e
topology: v6e:2x2x1
jax: 0.10.0
libtpu: 0.0.40
codegen_flags: <defaults>
</compile_context>

<pallas_src>
import functools

import jax
import jax.numpy as jnp
from jax.experimental import pallas as pl
from jax.experimental.pallas import tpu as pltpu


def _csmha_kernel(xs_ref, wqkv_ref, bqkv_ref, wp_ref, bp_ref, o_ref, *,
                  num_heads, emb_size, seq_len, batch_tile):
    """One batch tile (TB batch rows) per grid step.

    xs_ref   : (TB, 3, N, E)  input streams for this batch tile
    wqkv_ref : (3, E, 3E)     packed [Wq | Wk | Wv] per stream, (in, out) layout
    bqkv_ref : (3, 1, 3E)     packed biases (f32)
    wp_ref   : (3, E, E)      output projection weights
    bp_ref   : (3, 1, E)      output projection biases (f32)
    o_ref    : (TB, 3, N, E)  per-stream outputs (wrapper reshapes to (B, 3N, E))
    """
    TB, N, E, H = batch_tile, seq_len, emb_size, num_heads
    D = E // H
    inv_scale = 1.0 / (E ** 0.5)      # PyTorch scales by emb_size ** 0.5
    cdt = xs_ref.dtype                # MXU operand dtype (f32 or bf16)

    xall = xs_ref[...]                # (TB, 3, N, E)

    # --- packed Q/K/V projection: one (TB*N, E) @ (E, 3E) matmul per stream --
    q, k, v = [], [], []
    for c in range(3):
        x2d = xall[:, c].reshape(TB * N, E)                 # fold batch into M
        qkv = jnp.dot(x2d, wqkv_ref[c],
                      preferred_element_type=jnp.float32) + bqkv_ref[c]
        qkv = qkv.reshape(TB, N, 3 * E)                     # f32
        q.append(qkv[:, :, :E] * inv_scale)                 # scale folded into Q
        k.append(qkv[:, :, E:2 * E])
        v.append(qkv[:, :, 2 * E:])

    # --- cross-stream attention with the output projection fused per head ----
    def attend(c_out, c_q, c_kv):
        qm, km, vm = q[c_q], k[c_kv], v[c_kv]               # (TB, N, E) f32
        wpc = wp_ref[c_out]                                 # (E, E) in cdt
        acc = None                                          # (TB*N, E) f32
        for h in range(H):
            sl = slice(h * D, (h + 1) * D)
            s = jnp.einsum('bqd,bkd->bqk',
                           qm[:, :, sl].astype(cdt), km[:, :, sl].astype(cdt),
                           preferred_element_type=jnp.float32)   # (TB, N, N)
            s = s - jnp.max(s, axis=-1, keepdims=True)
            p = jnp.exp(s)
            p = p * pl.reciprocal(jnp.sum(p, axis=-1, keepdims=True), approx=True)
            oh = jnp.einsum('bqk,bkd->bqd',
                            p.astype(cdt), vm[:, :, sl].astype(cdt),
                            preferred_element_type=jnp.float32)  # (TB, N, D)
            upd = jnp.dot(oh.reshape(TB * N, D).astype(cdt), wpc[sl, :],
                          preferred_element_type=jnp.float32)    # (TB*N, E)
            acc = upd if acc is None else acc + upd
        out = acc + bp_ref[c_out]                                # (TB*N, E) f32
        o_ref[:, c_out:c_out + 1, :, :] = (
            out.reshape(TB, 1, N, E).astype(o_ref.dtype))

    attend(0, 1, 2)   # out1 = proj1(softmax(q2 k3) v3)
    attend(1, 2, 0)   # out2 = proj2(softmax(q3 k1) v1)
    attend(2, 0, 1)   # out3 = proj3(softmax(q1 k2) v2)


def _pick_batch_tile(B, N, E):
    """Largest divisor of B giving >=~512 matmul rows where possible while the
    per-step f32 intermediates stay well under VMEM (v7x has 64 MiB/TC)."""
    row_bytes = 4 * (3 * N * E        # input streams
                     + 9 * N * E      # packed qkv activations (f32)
                     + 3 * N * E      # accumulators / outputs
                     + 2 * N * N)     # one head's score matrix + slack
    budget = 8 * 1024 * 1024
    target_tb = max(1, 512 // max(N, 1))
    max_tb = max(1, min(budget // max(row_bytes, 1), target_tb))
    tb = 1
    for d in range(1, B + 1):
        if B % d == 0 and d <= max_tb:
            tb = d
    return tb


def cs_multi_head_attention(x, params, *, num_heads):
    """x: (B, 3*N, E).  Returns (B, 3*N, E) in x.dtype.

    Pass bf16 `x` to run the MXU-facing matmuls in bf16 (weights are cast to
    x.dtype inside this wrapper); accumulation is always f32 in the kernel.
    """
    B, S3, E = x.shape
    assert S3 % 3 == 0
    N = S3 // 3
    assert E % num_heads == 0

    wq, bq, wk, bk, wv, bv, wp, bp = params   # (3, E, E) / (3, 1, E), (in, out)

    cdt = x.dtype
    # Pack [Wq | Wk | Wv] per stream -> one (E, 3E) matmul per stream.
    # (In a real model, pack once at parameter-initialization time.)
    wqkv = jnp.concatenate([wq, wk, wv], axis=-1).astype(cdt)          # (3, E, 3E)
    bqkv = jnp.concatenate([bq, bk, bv], axis=-1).astype(jnp.float32)  # (3, 1, 3E)
    wp_c = wp.astype(cdt)
    bp_c = bp.astype(jnp.float32)

    # (B, 3N, E) -> (B, 3, N, E): torch.chunk(x, 3, dim=1) is exactly this view.
    xs = x.reshape(B, 3, N, E)

    TB = _pick_batch_tile(B, N, E)
    grid = (B // TB,)

    kernel = functools.partial(_csmha_kernel, num_heads=num_heads,
                               emb_size=E, seq_len=N, batch_tile=TB)

    # Weights/biases are grid-invariant (index_map always returns block 0), so
    # Pallas keeps the resident copy instead of re-fetching each step.
    def w_spec(shape):
        return pl.BlockSpec(shape, lambda b: (0,) * len(shape))

    x_bytes = jnp.dtype(x.dtype).itemsize
    w_bytes = jnp.dtype(cdt).itemsize
    flops = int(2 * B * N * E * (12 * E + 6 * N))      # 24*B*N*E^2 + 12*B*N^2*E
    transcendentals = int(3 * B * num_heads * N * N)
    bytes_accessed = int(2 * B * 3 * N * E * x_bytes
                         + (wqkv.size + wp_c.size) * w_bytes
                         + (bqkv.size + bp_c.size) * 4)

    # VMEM budget: double-buffered activation blocks + resident weights + f32
    # intermediates, floored at 32 MiB and capped at a v7x-safe 48 MiB.
    block_bytes = (2 * TB * 3 * N * E * x_bytes * 2
                   + (wqkv.size + wp_c.size) * w_bytes * 2
                   + (bqkv.size + bp_c.size) * 4 * 2
                   + 16 * TB * N * E * 4)
    vmem_limit = int(max(32 * 1024 * 1024, min(block_bytes, 48 * 1024 * 1024)))

    out = pl.pallas_call(
        kernel,
        out_shape=jax.ShapeDtypeStruct((B, 3, N, E), x.dtype),
        grid=grid,
        in_specs=[
            pl.BlockSpec((TB, 3, N, E), lambda b: (b, 0, 0, 0)),   # xs
            w_spec((3, E, 3 * E)),                                  # packed Wqkv
            w_spec((3, 1, 3 * E)),                                  # packed bqkv
            w_spec((3, E, E)),                                      # Wp
            w_spec((3, 1, E)),                                      # bp
        ],
        out_specs=pl.BlockSpec((TB, 3, N, E), lambda b: (b, 0, 0, 0)),
        compiler_params=pltpu.CompilerParams(
            dimension_semantics=("parallel",),
            vmem_limit_bytes=vmem_limit),
        cost_estimate=pl.CostEstimate(flops=flops,
                                      transcendentals=transcendentals,
                                      bytes_accessed=bytes_accessed),
    )(xs, wqkv, bqkv, wp_c, bp_c)

    # (B, 3, N, E) -> (B, 3N, E) == concat([out1, out2, out3], dim=1) (free view)
    return out.reshape(B, 3 * N, E)


def _reference(x, params, *, num_heads):
    """Pure-JAX reference mirroring the PyTorch forward (eval mode)."""
    B, S3, E = x.shape
    N = S3 // 3
    H = num_heads
    D = E // H
    x1, x2, x3 = jnp.split(x, 3, axis=1)
    wq, bq, wk, bk, wv, bv, wp, bp = params

    def lin(xc, w, b):
        return jnp.einsum('bne,ef->bnf', xc, w) + b[0]

    def heads(t):  # (B,N,E) -> (B,H,N,D)
        return t.reshape(B, N, H, D).transpose(0, 2, 1, 3)

    xs = [x1, x2, x3]
    q = [heads(lin(xs[c], wq[c], bq[c])) for c in range(3)]
    k = [heads(lin(xs[c], wk[c], bk[c])) for c in range(3)]
    v = [heads(lin(xs[c], wv[c], bv[c])) for c in range(3)]
    scale = E ** 0.5

    def attn(qm, km, vm):
        e = jnp.einsum('bhqd,bhkd->bhqk', qm, km) / scale
        a = jax.nn.softmax(e, axis=-1)
        o = jnp.einsum('bhal,bhlv->bhav', a, vm)
        return o.transpose(0, 2, 1, 3).reshape(B, N, E)

    o1 = jnp.einsum('bne,ef->bnf', attn(q[1], k[2], v[2]), wp[0]) + bp[0, 0]
    o2 = jnp.einsum('bne,ef->bnf', attn(q[2], k[0], v[0]), wp[1]) + bp[1, 0]
    o3 = jnp.einsum('bne,ef->bnf', attn(q[0], k[1], v[1]), wp[2]) + bp[2, 0]
    return jnp.concatenate([o1, o2, o3], axis=1)


def _make_params(key, emb_size):
    """Deterministic params.  Weights stored transposed as (in, out) so the
    kernel computes x @ W (equivalent to PyTorch's x @ W_torch.T)."""
    ks = jax.random.split(key, 8)
    def w(k):
        return 0.1 * jax.random.normal(k, (3, emb_size, emb_size), jnp.float32)
    def b(k):
        return 0.1 * jax.random.normal(k, (3, 1, emb_size), jnp.float32)
    return (w(ks[0]), b(ks[1]),   # queries
            w(ks[2]), b(ks[3]),   # keys
            w(ks[4]), b(ks[5]),   # values
            w(ks[6]), b(ks[7]))   # projections


if __name__ == "__main__":
    B, N, E, H = 2, 8, 32, 4          # input x: (B, 3*N, E) = (2, 24, 32)
    key = jax.random.PRNGKey(0)
    kx, kp = jax.random.split(key)
    x = jax.random.normal(kx, (B, 3 * N, E), jnp.float32)
    params = _make_params(kp, E)

    ref = _reference(x, params, num_heads=H)

    # f32-operand path (approx reciprocal in softmax -> loose-ish tolerance).
    out = jax.block_until_ready(cs_multi_head_attention(x, params, num_heads=H))
    assert out.shape == (B, 3 * N, E)
    assert jnp.allclose(out, ref, atol=2e-2, rtol=2e-2), "f32 mismatch vs reference"

    # bf16-operand path (MXU-rate operands, f32 accumulation inside the kernel).
    out_bf16 = jax.block_until_ready(
        cs_multi_head_attention(x.astype(jnp.bfloat16), params, num_heads=H))
    assert jnp.allclose(out_bf16.astype(jnp.float32), ref,
                        atol=1e-1, rtol=1e-1), "bf16 mismatch vs reference"

    print("KERNEL_OK")
</pallas_src>

<mosaic_0001>
module attributes {stable_mosaic.version = 11 : i64} {
  func.func @_csmha_kernel(%arg0: i32, %arg1: memref<2x3x8x32xf32, #tpu.memory_space<vmem>>, %arg2: memref<3x32x96xf32, #tpu.memory_space<vmem>>, %arg3: memref<3x1x96xf32, #tpu.memory_space<vmem>>, %arg4: memref<3x32x32xf32, #tpu.memory_space<vmem>>, %arg5: memref<3x1x32xf32, #tpu.memory_space<vmem>>, %arg6: memref<2x3x8x32xf32, #tpu.memory_space<vmem>>) attributes {dimension_semantics = [#tpu.dimension_semantics<parallel>], iteration_bounds = array<i64: 1>, scalar_prefetch = 0 : i64, scratch_operands = 0 : i64, tpu.core_type = #tpu.core_type<tc>, window_params = [{transform_indices = @transform_0, window_bounds = array<i64: 2, 3, 8, 32>}, {pipeline_mode = #tpu.pipeline_mode<synchronous>, transform_indices = @transform_1, window_bounds = array<i64: 3, 32, 96>}, {pipeline_mode = #tpu.pipeline_mode<synchronous>, transform_indices = @transform_2, window_bounds = array<i64: 3, 1, 96>}, {pipeline_mode = #tpu.pipeline_mode<synchronous>, transform_indices = @transform_3, window_bounds = array<i64: 3, 32, 32>}, {pipeline_mode = #tpu.pipeline_mode<synchronous>, transform_indices = @transform_4, window_bounds = array<i64: 3, 1, 32>}, {transform_indices = @transform_5, window_bounds = array<i64: 2, 3, 8, 32>}]} {
    %c0 = arith.constant 0 : index
    %c0_0 = arith.constant 0 : index
    %c0_1 = arith.constant 0 : index
    %c0_2 = arith.constant 0 : index
    %0 = vector.load %arg1[%c0, %c0_0, %c0_1, %c0_2] : memref<2x3x8x32xf32, #tpu.memory_space<vmem>>, vector<2x3x8x32xf32>
    %1 = vector.extract_strided_slice %0 {offsets = [0, 0, 0, 0], sizes = [2, 1, 8, 32], strides = [1, 1, 1, 1]} : vector<2x3x8x32xf32> to vector<2x1x8x32xf32>
    %2 = vector.shape_cast %1 : vector<2x1x8x32xf32> to vector<2x8x32xf32>
    %3 = vector.shape_cast %2 : vector<2x8x32xf32> to vector<16x32xf32>
    %c0_3 = arith.constant 0 : index
    %c0_4 = arith.constant 0 : index
    %c0_5 = arith.constant 0 : index
    %4 = vector.load %arg2[%c0_3, %c0_4, %c0_5] : memref<3x32x96xf32, #tpu.memory_space<vmem>>, vector<1x32x96xf32>
    %5 = vector.shape_cast %4 : vector<1x32x96xf32> to vector<32x96xf32>
    %cst = arith.constant dense<0.000000e+00> : vector<16x96xf32>
    %6 = tpu.matmul %3, %5, %cst {dimension_numbers = #tpu.dot_dimension_numbers<[1], [0], [0], [1], [0, 0, 1, 1], [], []>} : vector<16x32xf32>, vector<32x96xf32>, vector<16x96xf32> -> vector<16x96xf32>
    %c0_6 = arith.constant 0 : index
    %c0_7 = arith.constant 0 : index
    %c0_8 = arith.constant 0 : index
    %7 = vector.load %arg3[%c0_6, %c0_7, %c0_8] : memref<3x1x96xf32, #tpu.memory_space<vmem>>, vector<1x1x96xf32>
    %8 = vector.shape_cast %7 : vector<1x1x96xf32> to vector<1x96xf32>
    %9 = vector.broadcast %8 : vector<1x96xf32> to vector<16x96xf32>
    %10 = arith.addf %6, %9 : vector<16x96xf32>
    %11 = vector.shape_cast %10 : vector<16x96xf32> to vector<2x8x96xf32>
    %12 = vector.extract_strided_slice %11 {offsets = [0, 0, 0], sizes = [2, 8, 32], strides = [1, 1, 1]} : vector<2x8x96xf32> to vector<2x8x32xf32>
    %cst_9 = arith.constant 0.176776692 : f32
    %13 = vector.broadcast %cst_9 : f32 to vector<2x8x32xf32>
    %14 = arith.mulf %12, %13 : vector<2x8x32xf32>
    %15 = vector.extract_strided_slice %11 {offsets = [0, 0, 32], sizes = [2, 8, 32], strides = [1, 1, 1]} : vector<2x8x96xf32> to vector<2x8x32xf32>
    %16 = vector.extract_strided_slice %11 {offsets = [0, 0, 64], sizes = [2, 8, 32], strides = [1, 1, 1]} : vector<2x8x96xf32> to vector<2x8x32xf32>
    %17 = vector.extract_strided_slice %0 {offsets = [0, 1, 0, 0], sizes = [2, 1, 8, 32], strides = [1, 1, 1, 1]} : vector<2x3x8x32xf32> to vector<2x1x8x32xf32>
    %18 = vector.shape_cast %17 : vector<2x1x8x32xf32> to vector<2x8x32xf32>
    %19 = vector.shape_cast %18 : vector<2x8x32xf32> to vector<16x32xf32>
    %c1 = arith.constant 1 : index
    %c0_10 = arith.constant 0 : index
    %c0_11 = arith.constant 0 : index
    %20 = vector.load %arg2[%c1, %c0_10, %c0_11] : memref<3x32x96xf32, #tpu.memory_space<vmem>>, vector<1x32x96xf32>
    %21 = vector.shape_cast %20 : vector<1x32x96xf32> to vector<32x96xf32>
    %cst_12 = arith.constant dense<0.000000e+00> : vector<16x96xf32>
    %22 = tpu.matmul %19, %21, %cst_12 {dimension_numbers = #tpu.dot_dimension_numbers<[1], [0], [0], [1], [0, 0, 1, 1], [], []>} : vector<16x32xf32>, vector<32x96xf32>, vector<16x96xf32> -> vector<16x96xf32>
    %c1_13 = arith.constant 1 : index
    %c0_14 = arith.constant 0 : index
    %c0_15 = arith.constant 0 : index
    %23 = vector.load %arg3[%c1_13, %c0_14, %c0_15] : memref<3x1x96xf32, #tpu.memory_space<vmem>>, vector<1x1x96xf32>
    %24 = vector.shape_cast %23 : vector<1x1x96xf32> to vector<1x96xf32>
    %25 = vector.broadcast %24 : vector<1x96xf32> to vector<16x96xf32>
    %26 = arith.addf %22, %25 : vector<16x96xf32>
    %27 = vector.shape_cast %26 : vector<16x96xf32> to vector<2x8x96xf32>
    %28 = vector.extract_strided_slice %27 {offsets = [0, 0, 0], sizes = [2, 8, 32], strides = [1, 1, 1]} : vector<2x8x96xf32> to vector<2x8x32xf32>
    %cst_16 = arith.constant 0.176776692 : f32
    %29 = vector.broadcast %cst_16 : f32 to vector<2x8x32xf32>
    %30 = arith.mulf %28, %29 : vector<2x8x32xf32>
    %31 = vector.extract_strided_slice %27 {offsets = [0, 0, 32], sizes = [2, 8, 32], strides = [1, 1, 1]} : vector<2x8x96xf32> to vector<2x8x32xf32>
    %32 = vector.extract_strided_slice %27 {offsets = [0, 0, 64], sizes = [2, 8, 32], strides = [1, 1, 1]} : vector<2x8x96xf32> to vector<2x8x32xf32>
    %33 = vector.extract_strided_slice %0 {offsets = [0, 2, 0, 0], sizes = [2, 1, 8, 32], strides = [1, 1, 1, 1]} : vector<2x3x8x32xf32> to vector<2x1x8x32xf32>
    %34 = vector.shape_cast %33 : vector<2x1x8x32xf32> to vector<2x8x32xf32>
    %35 = vector.shape_cast %34 : vector<2x8x32xf32> to vector<16x32xf32>
    %c2 = arith.constant 2 : index
    %c0_17 = arith.constant 0 : index
    %c0_18 = arith.constant 0 : index
    %36 = vector.load %arg2[%c2, %c0_17, %c0_18] : memref<3x32x96xf32, #tpu.memory_space<vmem>>, vector<1x32x96xf32>
    %37 = vector.shape_cast %36 : vector<1x32x96xf32> to vector<32x96xf32>
    %cst_19 = arith.constant dense<0.000000e+00> : vector<16x96xf32>
    %38 = tpu.matmul %35, %37, %cst_19 {dimension_numbers = #tpu.dot_dimension_numbers<[1], [0], [0], [1], [0, 0, 1, 1], [], []>} : vector<16x32xf32>, vector<32x96xf32>, vector<16x96xf32> -> vector<16x96xf32>
    %c2_20 = arith.constant 2 : index
    %c0_21 = arith.constant 0 : index
    %c0_22 = arith.constant 0 : index
    %39 = vector.load %arg3[%c2_20, %c0_21, %c0_22] : memref<3x1x96xf32, #tpu.memory_space<vmem>>, vector<1x1x96xf32>
    %40 = vector.shape_cast %39 : vector<1x1x96xf32> to vector<1x96xf32>
    %41 = vector.broadcast %40 : vector<1x96xf32> to vector<16x96xf32>
    %42 = arith.addf %38, %41 : vector<16x96xf32>
    %43 = vector.shape_cast %42 : vector<16x96xf32> to vector<2x8x96xf32>
    %44 = vector.extract_strided_slice %43 {offsets = [0, 0, 0], sizes = [2, 8, 32], strides = [1, 1, 1]} : vector<2x8x96xf32> to vector<2x8x32xf32>
    %cst_23 = arith.constant 0.176776692 : f32
    %45 = vector.broadcast %cst_23 : f32 to vector<2x8x32xf32>
    %46 = arith.mulf %44, %45 : vector<2x8x32xf32>
    %47 = vector.extract_strided_slice %43 {offsets = [0, 0, 32], sizes = [2, 8, 32], strides = [1, 1, 1]} : vector<2x8x96xf32> to vector<2x8x32xf32>
    %48 = vector.extract_strided_slice %43 {offsets = [0, 0, 64], sizes = [2, 8, 32], strides = [1, 1, 1]} : vector<2x8x96xf32> to vector<2x8x32xf32>
    %c0_24 = arith.constant 0 : index
    %c0_25 = arith.constant 0 : index
    %c0_26 = arith.constant 0 : index
    %49 = vector.load %arg4[%c0_24, %c0_25, %c0_26] : memref<3x32x32xf32, #tpu.memory_space<vmem>>, vector<1x32x32xf32>
    %50 = vector.shape_cast %49 : vector<1x32x32xf32> to vector<32x32xf32>
    %51 = vector.extract_strided_slice %30 {offsets = [0, 0, 0], sizes = [2, 8, 8], strides = [1, 1, 1]} : vector<2x8x32xf32> to vector<2x8x8xf32>
    %52 = vector.extract_strided_slice %47 {offsets = [0, 0, 0], sizes = [2, 8, 8], strides = [1, 1, 1]} : vector<2x8x32xf32> to vector<2x8x8xf32>
    "tpu.trace_start"() <{level = 10 : i32, message = "bqd,bkd->bqk"}> : () -> ()
    %cst_27 = arith.constant dense<0.000000e+00> : vector<2x8x8xf32>
    %53 = tpu.matmul %51, %52, %cst_27 {dimension_numbers = #tpu.dot_dimension_numbers<[2], [2], [1], [1], [0, 0, 0, 1, 1, 1], [0], [0]>} : vector<2x8x8xf32>, vector<2x8x8xf32>, vector<2x8x8xf32> -> vector<2x8x8xf32>
    "tpu.trace_stop"() : () -> ()
    %cst_28 = arith.constant dense<0xFF800000> : vector<2x8xf32>
    %54 = vector.multi_reduction <maximumf>, %53, %cst_28 [2] : vector<2x8x8xf32> to vector<2x8xf32>
    %55 = vector.shape_cast %54 : vector<2x8xf32> to vector<2x8x1xf32>
    %56 = vector.broadcast %55 : vector<2x8x1xf32> to vector<2x8x8xf32>
    %57 = arith.subf %53, %56 : vector<2x8x8xf32>
    %58 = math.exp %57 : vector<2x8x8xf32>
    %cst_29 = arith.constant dense<0.000000e+00> : vector<2x8xf32>
    %59 = vector.multi_reduction <add>, %58, %cst_29 [2] : vector<2x8x8xf32> to vector<2x8xf32>
    %60 = vector.shape_cast %59 : vector<2x8xf32> to vector<2x8x1xf32>
    %61 = tpu.reciprocal %60 {approx = true} : vector<2x8x1xf32> -> vector<2x8x1xf32>
    %62 = vector.broadcast %61 : vector<2x8x1xf32> to vector<2x8x8xf32>
    %63 = arith.mulf %58, %62 : vector<2x8x8xf32>
    %64 = vector.extract_strided_slice %48 {offsets = [0, 0, 0], sizes = [2, 8, 8], strides = [1, 1, 1]} : vector<2x8x32xf32> to vector<2x8x8xf32>
    "tpu.trace_start"() <{level = 10 : i32, message = "bqk,bkd->bqd"}> : () -> ()
    %cst_30 = arith.constant dense<0.000000e+00> : vector<2x8x8xf32>
    %65 = tpu.matmul %63, %64, %cst_30 {dimension_numbers = #tpu.dot_dimension_numbers<[2], [1], [1], [2], [0, 0, 0, 1, 1, 2], [0], [0]>} : vector<2x8x8xf32>, vector<2x8x8xf32>, vector<2x8x8xf32> -> vector<2x8x8xf32>
    "tpu.trace_stop"() : () -> ()
    %66 = vector.shape_cast %65 : vector<2x8x8xf32> to vector<16x8xf32>
    %67 = vector.extract_strided_slice %50 {offsets = [0, 0], sizes = [8, 32], strides = [1, 1]} : vector<32x32xf32> to vector<8x32xf32>
    %cst_31 = arith.constant dense<0.000000e+00> : vector<16x32xf32>
    %68 = tpu.matmul %66, %67, %cst_31 {dimension_numbers = #tpu.dot_dimension_numbers<[1], [0], [0], [1], [0, 0, 1, 1], [], []>} : vector<16x8xf32>, vector<8x32xf32>, vector<16x32xf32> -> vector<16x32xf32>
    %69 = vector.extract_strided_slice %30 {offsets = [0, 0, 8], sizes = [2, 8, 8], strides = [1, 1, 1]} : vector<2x8x32xf32> to vector<2x8x8xf32>
    %70 = vector.extract_strided_slice %47 {offsets = [0, 0, 8], sizes = [2, 8, 8], strides = [1, 1, 1]} : vector<2x8x32xf32> to vector<2x8x8xf32>
    "tpu.trace_start"() <{level = 10 : i32, message = "bqd,bkd->bqk"}> : () -> ()
    %cst_32 = arith.constant dense<0.000000e+00> : vector<2x8x8xf32>
    %71 = tpu.matmul %69, %70, %cst_32 {dimension_numbers = #tpu.dot_dimension_numbers<[2], [2], [1], [1], [0, 0, 0, 1, 1, 1], [0], [0]>} : vector<2x8x8xf32>, vector<2x8x8xf32>, vector<2x8x8xf32> -> vector<2x8x8xf32>
    "tpu.trace_stop"() : () -> ()
    %cst_33 = arith.constant dense<0xFF800000> : vector<2x8xf32>
    %72 = vector.multi_reduction <maximumf>, %71, %cst_33 [2] : vector<2x8x8xf32> to vector<2x8xf32>
    %73 = vector.shape_cast %72 : vector<2x8xf32> to vector<2x8x1xf32>
    %74 = vector.broadcast %73 : vector<2x8x1xf32> to vector<2x8x8xf32>
    %75 = arith.subf %71, %74 : vector<2x8x8xf32>
    %76 = math.exp %75 : vector<2x8x8xf32>
    %cst_34 = arith.constant dense<0.000000e+00> : vector<2x8xf32>
    %77 = vector.multi_reduction <add>, %76, %cst_34 [2] : vector<2x8x8xf32> to vector<2x8xf32>
    %78 = vector.shape_cast %77 : vector<2x8xf32> to vector<2x8x1xf32>
    %79 = tpu.reciprocal %78 {approx = true} : vector<2x8x1xf32> -> vector<2x8x1xf32>
    %80 = vector.broadcast %79 : vector<2x8x1xf32> to vector<2x8x8xf32>
    %81 = arith.mulf %76, %80 : vector<2x8x8xf32>
    %82 = vector.extract_strided_slice %48 {offsets = [0, 0, 8], sizes = [2, 8, 8], strides = [1, 1, 1]} : vector<2x8x32xf32> to vector<2x8x8xf32>
    "tpu.trace_start"() <{level = 10 : i32, message = "bqk,bkd->bqd"}> : () -> ()
    %cst_35 = arith.constant dense<0.000000e+00> : vector<2x8x8xf32>
    %83 = tpu.matmul %81, %82, %cst_35 {dimension_numbers = #tpu.dot_dimension_numbers<[2], [1], [1], [2], [0, 0, 0, 1, 1, 2], [0], [0]>} : vector<2x8x8xf32>, vector<2x8x8xf32>, vector<2x8x8xf32> -> vector<2x8x8xf32>
    "tpu.trace_stop"() : () -> ()
    %84 = vector.shape_cast %83 : vector<2x8x8xf32> to vector<16x8xf32>
    %85 = vector.extract_strided_slice %50 {offsets = [8, 0], sizes = [8, 32], strides = [1, 1]} : vector<32x32xf32> to vector<8x32xf32>
    %cst_36 = arith.constant dense<0.000000e+00> : vector<16x32xf32>
    %86 = tpu.matmul %84, %85, %cst_36 {dimension_numbers = #tpu.dot_dimension_numbers<[1], [0], [0], [1], [0, 0, 1, 1], [], []>} : vector<16x8xf32>, vector<8x32xf32>, vector<16x32xf32> -> vector<16x32xf32>
    %87 = arith.addf %68, %86 : vector<16x32xf32>
    %88 = vector.extract_strided_slice %30 {offsets = [0, 0, 16], sizes = [2, 8, 8], strides = [1, 1, 1]} : vector<2x8x32xf32> to vector<2x8x8xf32>
    %89 = vector.extract_strided_slice %47 {offsets = [0, 0, 16], sizes = [2, 8, 8], strides = [1, 1, 1]} : vector<2x8x32xf32> to vector<2x8x8xf32>
    "tpu.trace_start"() <{level = 10 : i32, message = "bqd,bkd->bqk"}> : () -> ()
    %cst_37 = arith.constant dense<0.000000e+00> : vector<2x8x8xf32>
    %90 = tpu.matmul %88, %89, %cst_37 {dimension_numbers = #tpu.dot_dimension_numbers<[2], [2], [1], [1], [0, 0, 0, 1, 1, 1], [0], [0]>} : vector<2x8x8xf32>, vector<2x8x8xf32>, vector<2x8x8xf32> -> vector<2x8x8xf32>
    "tpu.trace_stop"() : () -> ()
    %cst_38 = arith.constant dense<0xFF800000> : vector<2x8xf32>
    %91 = vector.multi_reduction <maximumf>, %90, %cst_38 [2] : vector<2x8x8xf32> to vector<2x8xf32>
    %92 = vector.shape_cast %91 : vector<2x8xf32> to vector<2x8x1xf32>
    %93 = vector.broadcast %92 : vector<2x8x1xf32> to vector<2x8x8xf32>
    %94 = arith.subf %90, %93 : vector<2x8x8xf32>
    %95 = math.exp %94 : vector<2x8x8xf32>
    %cst_39 = arith.constant dense<0.000000e+00> : vector<2x8xf32>
    %96 = vector.multi_reduction <add>, %95, %cst_39 [2] : vector<2x8x8xf32> to vector<2x8xf32>
    %97 = vector.shape_cast %96 : vector<2x8xf32> to vector<2x8x1xf32>
    %98 = tpu.reciprocal %97 {approx = true} : vector<2x8x1xf32> -> vector<2x8x1xf32>
    %99 = vector.broadcast %98 : vector<2x8x1xf32> to vector<2x8x8xf32>
    %100 = arith.mulf %95, %99 : vector<2x8x8xf32>
    %101 = vector.extract_strided_slice %48 {offsets = [0, 0, 16], sizes = [2, 8, 8], strides = [1, 1, 1]} : vector<2x8x32xf32> to vector<2x8x8xf32>
    "tpu.trace_start"() <{level = 10 : i32, message = "bqk,bkd->bqd"}> : () -> ()
    %cst_40 = arith.constant dense<0.000000e+00> : vector<2x8x8xf32>
    %102 = tpu.matmul %100, %101, %cst_40 {dimension_numbers = #tpu.dot_dimension_numbers<[2], [1], [1], [2], [0, 0, 0, 1, 1, 2], [0], [0]>} : vector<2x8x8xf32>, vector<2x8x8xf32>, vector<2x8x8xf32> -> vector<2x8x8xf32>
    "tpu.trace_stop"() : () -> ()
    %103 = vector.shape_cast %102 : vector<2x8x8xf32> to vector<16x8xf32>
    %104 = vector.extract_strided_slice %50 {offsets = [16, 0], sizes = [8, 32], strides = [1, 1]} : vector<32x32xf32> to vector<8x32xf32>
    %cst_41 = arith.constant dense<0.000000e+00> : vector<16x32xf32>
    %105 = tpu.matmul %103, %104, %cst_41 {dimension_numbers = #tpu.dot_dimension_numbers<[1], [0], [0], [1], [0, 0, 1, 1], [], []>} : vector<16x8xf32>, vector<8x32xf32>, vector<16x32xf32> -> vector<16x32xf32>
    %106 = arith.addf %87, %105 : vector<16x32xf32>
    %107 = vector.extract_strided_slice %30 {offsets = [0, 0, 24], sizes = [2, 8, 8], strides = [1, 1, 1]} : vector<2x8x32xf32> to vector<2x8x8xf32>
    %108 = vector.extract_strided_slice %47 {offsets = [0, 0, 24], sizes = [2, 8, 8], strides = [1, 1, 1]} : vector<2x8x32xf32> to vector<2x8x8xf32>
    "tpu.trace_start"() <{level = 10 : i32, message = "bqd,bkd->bqk"}> : () -> ()
    %cst_42 = arith.constant dense<0.000000e+00> : vector<2x8x8xf32>
    %109 = tpu.matmul %107, %108, %cst_42 {dimension_numbers = #tpu.dot_dimension_numbers<[2], [2], [1], [1], [0, 0, 0, 1, 1, 1], [0], [0]>} : vector<2x8x8xf32>, vector<2x8x8xf32>, vector<2x8x8xf32> -> vector<2x8x8xf32>
    "tpu.trace_stop"() : () -> ()
    %cst_43 = arith.constant dense<0xFF800000> : vector<2x8xf32>
    %110 = vector.multi_reduction <maximumf>, %109, %cst_43 [2] : vector<2x8x8xf32> to vector<2x8xf32>
    %111 = vector.shape_cast %110 : vector<2x8xf32> to vector<2x8x1xf32>
    %112 = vector.broadcast %111 : vector<2x8x1xf32> to vector<2x8x8xf32>
    %113 = arith.subf %109, %112 : vector<2x8x8xf32>
    %114 = math.exp %113 : vector<2x8x8xf32>
    %cst_44 = arith.constant dense<0.000000e+00> : vector<2x8xf32>
    %115 = vector.multi_reduction <add>, %114, %cst_44 [2] : vector<2x8x8xf32> to vector<2x8xf32>
    %116 = vector.shape_cast %115 : vector<2x8xf32> to vector<2x8x1xf32>
    %117 = tpu.reciprocal %116 {approx = true} : vector<2x8x1xf32> -> vector<2x8x1xf32>
    %118 = vector.broadcast %117 : vector<2x8x1xf32> to vector<2x8x8xf32>
    %119 = arith.mulf %114, %118 : vector<2x8x8xf32>
    %120 = vector.extract_strided_slice %48 {offsets = [0, 0, 24], sizes = [2, 8, 8], strides = [1, 1, 1]} : vector<2x8x32xf32> to vector<2x8x8xf32>
    "tpu.trace_start"() <{level = 10 : i32, message = "bqk,bkd->bqd"}> : () -> ()
    %cst_45 = arith.constant dense<0.000000e+00> : vector<2x8x8xf32>
    %121 = tpu.matmul %119, %120, %cst_45 {dimension_numbers = #tpu.dot_dimension_numbers<[2], [1], [1], [2], [0, 0, 0, 1, 1, 2], [0], [0]>} : vector<2x8x8xf32>, vector<2x8x8xf32>, vector<2x8x8xf32> -> vector<2x8x8xf32>
    "tpu.trace_stop"() : () -> ()
    %122 = vector.shape_cast %121 : vector<2x8x8xf32> to vector<16x8xf32>
    %123 = vector.extract_strided_slice %50 {offsets = [24, 0], sizes = [8, 32], strides = [1, 1]} : vector<32x32xf32> to vector<8x32xf32>
    %cst_46 = arith.constant dense<0.000000e+00> : vector<16x32xf32>
    %124 = tpu.matmul %122, %123, %cst_46 {dimension_numbers = #tpu.dot_dimension_numbers<[1], [0], [0], [1], [0, 0, 1, 1], [], []>} : vector<16x8xf32>, vector<8x32xf32>, vector<16x32xf32> -> vector<16x32xf32>
    %125 = arith.addf %106, %124 : vector<16x32xf32>
    %c0_47 = arith.constant 0 : index
    %c0_48 = arith.constant 0 : index
    %c0_49 = arith.constant 0 : index
    %126 = vector.load %arg5[%c0_47, %c0_48, %c0_49] : memref<3x1x32xf32, #tpu.memory_space<vmem>>, vector<1x1x32xf32>
    %127 = vector.shape_cast %126 : vector<1x1x32xf32> to vector<1x32xf32>
    %128 = vector.broadcast %127 : vector<1x32xf32> to vector<16x32xf32>
    %129 = arith.addf %125, %128 : vector<16x32xf32>
    %130 = vector.shape_cast %129 : vector<16x32xf32> to vector<2x1x8x32xf32>
    %c0_50 = arith.constant 0 : index
    %c0_51 = arith.constant 0 : index
    %c0_52 = arith.constant 0 : index
    %c0_53 = arith.constant 0 : index
    %131 = vector.load %arg6[%c0_50, %c0_51, %c0_52, %c0_53] : memref<2x3x8x32xf32, #tpu.memory_space<vmem>>, vector<2x1x8x32xf32>
    tpu.vector_store %arg6[%c0_50, %c0_51, %c0_52, %c0_53], %130 {strides = array<i32>} : memref<2x3x8x32xf32, #tpu.memory_space<vmem>>, vector<2x1x8x32xf32>,
    %c1_54 = arith.constant 1 : index
    %c0_55 = arith.constant 0 : index
    %c0_56 = arith.constant 0 : index
    %132 = vector.load %arg4[%c1_54, %c0_55, %c0_56] : memref<3x32x32xf32, #tpu.memory_space<vmem>>, vector<1x32x32xf32>
    %133 = vector.shape_cast %132 : vector<1x32x32xf32> to vector<32x32xf32>
    %134 = vector.extract_strided_slice %46 {offsets = [0, 0, 0], sizes = [2, 8, 8], strides = [1, 1, 1]} : vector<2x8x32xf32> to vector<2x8x8xf32>
    %135 = vector.extract_strided_slice %15 {offsets = [0, 0, 0], sizes = [2, 8, 8], strides = [1, 1, 1]} : vector<2x8x32xf32> to vector<2x8x8xf32>
    "tpu.trace_start"() <{level = 10 : i32, message = "bqd,bkd->bqk"}> : () -> ()
    %cst_57 = arith.constant dense<0.000000e+00> : vector<2x8x8xf32>
    %136 = tpu.matmul %134, %135, %cst_57 {dimension_numbers = #tpu.dot_dimension_numbers<[2], [2], [1], [1], [0, 0, 0, 1, 1, 1], [0], [0]>} : vector<2x8x8xf32>, vector<2x8x8xf32>, vector<2x8x8xf32> -> vector<2x8x8xf32>
    "tpu.trace_stop"() : () -> ()
    %cst_58 = arith.constant dense<0xFF800000> : vector<2x8xf32>
    %137 = vector.multi_reduction <maximumf>, %136, %cst_58 [2] : vector<2x8x8xf32> to vector<2x8xf32>
    %138 = vector.shape_cast %137 : vector<2x8xf32> to vector<2x8x1xf32>
    %139 = vector.broadcast %138 : vector<2x8x1xf32> to vector<2x8x8xf32>
    %140 = arith.subf %136, %139 : vector<2x8x8xf32>
    %141 = math.exp %140 : vector<2x8x8xf32>
    %cst_59 = arith.constant dense<0.000000e+00> : vector<2x8xf32>
    %142 = vector.multi_reduction <add>, %141, %cst_59 [2] : vector<2x8x8xf32> to vector<2x8xf32>
    %143 = vector.shape_cast %142 : vector<2x8xf32> to vector<2x8x1xf32>
    %144 = tpu.reciprocal %143 {approx = true} : vector<2x8x1xf32> -> vector<2x8x1xf32>
    %145 = vector.broadcast %144 : vector<2x8x1xf32> to vector<2x8x8xf32>
    %146 = arith.mulf %141, %145 : vector<2x8x8xf32>
    %147 = vector.extract_strided_slice %16 {offsets = [0, 0, 0], sizes = [2, 8, 8], strides = [1, 1, 1]} : vector<2x8x32xf32> to vector<2x8x8xf32>
    "tpu.trace_start"() <{level = 10 : i32, message = "bqk,bkd->bqd"}> : () -> ()
    %cst_60 = arith.constant dense<0.000000e+00> : vector<2x8x8xf32>
    %148 = tpu.matmul %146, %147, %cst_60 {dimension_numbers = #tpu.dot_dimension_numbers<[2], [1], [1], [2], [0, 0, 0, 1, 1, 2], [0], [0]>} : vector<2x8x8xf32>, vector<2x8x8xf32>, vector<2x8x8xf32> -> vector<2x8x8xf32>
    "tpu.trace_stop"() : () -> ()
    %149 = vector.shape_cast %148 : vector<2x8x8xf32> to vector<16x8xf32>
    %150 = vector.extract_strided_slice %133 {offsets = [0, 0], sizes = [8, 32], strides = [1, 1]} : vector<32x32xf32> to vector<8x32xf32>
    %cst_61 = arith.constant dense<0.000000e+00> : vector<16x32xf32>
    %151 = tpu.matmul %149, %150, %cst_61 {dimension_numbers = #tpu.dot_dimension_numbers<[1], [0], [0], [1], [0, 0, 1, 1], [], []>} : vector<16x8xf32>, vector<8x32xf32>, vector<16x32xf32> -> vector<16x32xf32>
    %152 = vector.extract_strided_slice %46 {offsets = [0, 0, 8], sizes = [2, 8, 8], strides = [1, 1, 1]} : vector<2x8x32xf32> to vector<2x8x8xf32>
    %153 = vector.extract_strided_slice %15 {offsets = [0, 0, 8], sizes = [2, 8, 8], strides = [1, 1, 1]} : vector<2x8x32xf32> to vector<2x8x8xf32>
    "tpu.trace_start"() <{level = 10 : i32, message = "bqd,bkd->bqk"}> : () -> ()
    %cst_62 = arith.constant dense<0.000000e+00> : vector<2x8x8xf32>
    %154 = tpu.matmul %152, %153, %cst_62 {dimension_numbers = #tpu.dot_dimension_numbers<[2], [2], [1], [1], [0, 0, 0, 1, 1, 1], [0], [0]>} : vector<2x8x8xf32>, vector<2x8x8xf32>, vector<2x8x8xf32> -> vector<2x8x8xf32>
    "tpu.trace_stop"() : () -> ()
    %cst_63 = arith.constant dense<0xFF800000> : vector<2x8xf32>
    %155 = vector.multi_reduction <maximumf>, %154, %cst_63 [2] : vector<2x8x8xf32> to vector<2x8xf32>
    %156 = vector.shape_cast %155 : vector<2x8xf32> to vector<2x8x1xf32>
    %157 = vector.broadcast %156 : vector<2x8x1xf32> to vector<2x8x8xf32>
    %158 = arith.subf %154, %157 : vector<2x8x8xf32>
    %159 = math.exp %158 : vector<2x8x8xf32>
    %cst_64 = arith.constant dense<0.000000e+00> : vector<2x8xf32>
    %160 = vector.multi_reduction <add>, %159, %cst_64 [2] : vector<2x8x8xf32> to vector<2x8xf32>
    %161 = vector.shape_cast %160 : vector<2x8xf32> to vector<2x8x1xf32>
    %162 = tpu.reciprocal %161 {approx = true} : vector<2x8x1xf32> -> vector<2x8x1xf32>
    %163 = vector.broadcast %162 : vector<2x8x1xf32> to vector<2x8x8xf32>
    %164 = arith.mulf %159, %163 : vector<2x8x8xf32>
    %165 = vector.extract_strided_slice %16 {offsets = [0, 0, 8], sizes = [2, 8, 8], strides = [1, 1, 1]} : vector<2x8x32xf32> to vector<2x8x8xf32>
    "tpu.trace_start"() <{level = 10 : i32, message = "bqk,bkd->bqd"}> : () -> ()
    %cst_65 = arith.constant dense<0.000000e+00> : vector<2x8x8xf32>
    %166 = tpu.matmul %164, %165, %cst_65 {dimension_numbers = #tpu.dot_dimension_numbers<[2], [1], [1], [2], [0, 0, 0, 1, 1, 2], [0], [0]>} : vector<2x8x8xf32>, vector<2x8x8xf32>, vector<2x8x8xf32> -> vector<2x8x8xf32>
    "tpu.trace_stop"() : () -> ()
    %167 = vector.shape_cast %166 : vector<2x8x8xf32> to vector<16x8xf32>
    %168 = vector.extract_strided_slice %133 {offsets = [8, 0], sizes = [8, 32], strides = [1, 1]} : vector<32x32xf32> to vector<8x32xf32>
    %cst_66 = arith.constant dense<0.000000e+00> : vector<16x32xf32>
    %169 = tpu.matmul %167, %168, %cst_66 {dimension_numbers = #tpu.dot_dimension_numbers<[1], [0], [0], [1], [0, 0, 1, 1], [], []>} : vector<16x8xf32>, vector<8x32xf32>, vector<16x32xf32> -> vector<16x32xf32>
    %170 = arith.addf %151, %169 : vector<16x32xf32>
    %171 = vector.extract_strided_slice %46 {offsets = [0, 0, 16], sizes = [2, 8, 8], strides = [1, 1, 1]} : vector<2x8x32xf32> to vector<2x8x8xf32>
    %172 = vector.extract_strided_slice %15 {offsets = [0, 0, 16], sizes = [2, 8, 8], strides = [1, 1, 1]} : vector<2x8x32xf32> to vector<2x8x8xf32>
    "tpu.trace_start"() <{level = 10 : i32, message = "bqd,bkd->bqk"}> : () -> ()
    %cst_67 = arith.constant dense<0.000000e+00> : vector<2x8x8xf32>
    %173 = tpu.matmul %171, %172, %cst_67 {dimension_numbers = #tpu.dot_dimension_numbers<[2], [2], [1], [1], [0, 0, 0, 1, 1, 1], [0], [0]>} : vector<2x8x8xf32>, vector<2x8x8xf32>, vector<2x8x8xf32> -> vector<2x8x8xf32>
    "tpu.trace_stop"() : () -> ()
    %cst_68 = arith.constant dense<0xFF800000> : vector<2x8xf32>
    %174 = vector.multi_reduction <maximumf>, %173, %cst_68 [2] : vector<2x8x8xf32> to vector<2x8xf32>
    %175 = vector.shape_cast %174 : vector<2x8xf32> to vector<2x8x1xf32>
    %176 = vector.broadcast %175 : vector<2x8x1xf32> to vector<2x8x8xf32>
    %177 = arith.subf %173, %176 : vector<2x8x8xf32>
    %178 = math.exp %177 : vector<2x8x8xf32>
    %cst_69 = arith.constant dense<0.000000e+00> : vector<2x8xf32>
    %179 = vector.multi_reduction <add>, %178, %cst_69 [2] : vector<2x8x8xf32> to vector<2x8xf32>
    %180 = vector.shape_cast %179 : vector<2x8xf32> to vector<2x8x1xf32>
    %181 = tpu.reciprocal %180 {approx = true} : vector<2x8x1xf32> -> vector<2x8x1xf32>
    %182 = vector.broadcast %181 : vector<2x8x1xf32> to vector<2x8x8xf32>
    %183 = arith.mulf %178, %182 : vector<2x8x8xf32>
    %184 = vector.extract_strided_slice %16 {offsets = [0, 0, 16], sizes = [2, 8, 8], strides = [1, 1, 1]} : vector<2x8x32xf32> to vector<2x8x8xf32>
    "tpu.trace_start"() <{level = 10 : i32, message = "bqk,bkd->bqd"}> : () -> ()
    %cst_70 = arith.constant dense<0.000000e+00> : vector<2x8x8xf32>
    %185 = tpu.matmul %183, %184, %cst_70 {dimension_numbers = #tpu.dot_dimension_numbers<[2], [1], [1], [2], [0, 0, 0, 1, 1, 2], [0], [0]>} : vector<2x8x8xf32>, vector<2x8x8xf32>, vector<2x8x8xf32> -> vector<2x8x8xf32>
    "tpu.trace_stop"() : () -> ()
    %186 = vector.shape_cast %185 : vector<2x8x8xf32> to vector<16x8xf32>
    %187 = vector.extract_strided_slice %133 {offsets = [16, 0], sizes = [8, 32], strides = [1, 1]} : vector<32x32xf32> to vector<8x32xf32>
    %cst_71 = arith.constant dense<0.000000e+00> : vector<16x32xf32>
    %188 = tpu.matmul %186, %187, %cst_71 {dimension_numbers = #tpu.dot_dimension_numbers<[1], [0], [0], [1], [0, 0, 1, 1], [], []>} : vector<16x8xf32>, vector<8x32xf32>, vector<16x32xf32> -> vector<16x32xf32>
    %189 = arith.addf %170, %188 : vector<16x32xf32>
    %190 = vector.extract_strided_slice %46 {offsets = [0, 0, 24], sizes = [2, 8, 8], strides = [1, 1, 1]} : vector<2x8x32xf32> to vector<2x8x8xf32>
    %191 = vector.extract_strided_slice %15 {offsets = [0, 0, 24], sizes = [2, 8, 8], strides = [1, 1, 1]} : vector<2x8x32xf32> to vector<2x8x8xf32>
    "tpu.trace_start"() <{level = 10 : i32, message = "bqd,bkd->bqk"}> : () -> ()
    %cst_72 = arith.constant dense<0.000000e+00> : vector<2x8x8xf32>
    %192 = tpu.matmul %190, %191, %cst_72 {dimension_numbers = #tpu.dot_dimension_numbers<[2], [2], [1], [1], [0, 0, 0, 1, 1, 1], [0], [0]>} : vector<2x8x8xf32>, vector<2x8x8xf32>, vector<2x8x8xf32> -> vector<2x8x8xf32>
    "tpu.trace_stop"() : () -> ()
    %cst_73 = arith.constant dense<0xFF800000> : vector<2x8xf32>
    %193 = vector.multi_reduction <maximumf>, %192, %cst_73 [2] : vector<2x8x8xf32> to vector<2x8xf32>
    %194 = vector.shape_cast %193 : vector<2x8xf32> to vector<2x8x1xf32>
    %195 = vector.broadcast %194 : vector<2x8x1xf32> to vector<2x8x8xf32>
    %196 = arith.subf %192, %195 : vector<2x8x8xf32>
    %197 = math.exp %196 : vector<2x8x8xf32>
    %cst_74 = arith.constant dense<0.000000e+00> : vector<2x8xf32>
    %198 = vector.multi_reduction <add>, %197, %cst_74 [2] : vector<2x8x8xf32> to vector<2x8xf32>
    %199 = vector.shape_cast %198 : vector<2x8xf32> to vector<2x8x1xf32>
    %200 = tpu.reciprocal %199 {approx = true} : vector<2x8x1xf32> -> vector<2x8x1xf32>
    %201 = vector.broadcast %200 : vector<2x8x1xf32> to vector<2x8x8xf32>
    %202 = arith.mulf %197, %201 : vector<2x8x8xf32>
    %203 = vector.extract_strided_slice %16 {offsets = [0, 0, 24], sizes = [2, 8, 8], strides = [1, 1, 1]} : vector<2x8x32xf32> to vector<2x8x8xf32>
    "tpu.trace_start"() <{level = 10 : i32, message = "bqk,bkd->bqd"}> : () -> ()
    %cst_75 = arith.constant dense<0.000000e+00> : vector<2x8x8xf32>
    %204 = tpu.matmul %202, %203, %cst_75 {dimension_numbers = #tpu.dot_dimension_numbers<[2], [1], [1], [2], [0, 0, 0, 1, 1, 2], [0], [0]>} : vector<2x8x8xf32>, vector<2x8x8xf32>, vector<2x8x8xf32> -> vector<2x8x8xf32>
    "tpu.trace_stop"() : () -> ()
    %205 = vector.shape_cast %204 : vector<2x8x8xf32> to vector<16x8xf32>
    %206 = vector.extract_strided_slice %133 {offsets = [24, 0], sizes = [8, 32], strides = [1, 1]} : vector<32x32xf32> to vector<8x32xf32>
    %cst_76 = arith.constant dense<0.000000e+00> : vector<16x32xf32>
    %207 = tpu.matmul %205, %206, %cst_76 {dimension_numbers = #tpu.dot_dimension_numbers<[1], [0], [0], [1], [0, 0, 1, 1], [], []>} : vector<16x8xf32>, vector<8x32xf32>, vector<16x32xf32> -> vector<16x32xf32>
    %208 = arith.addf %189, %207 : vector<16x32xf32>
    %c1_77 = arith.constant 1 : index
    %c0_78 = arith.constant 0 : index
    %c0_79 = arith.constant 0 : index
    %209 = vector.load %arg5[%c1_77, %c0_78, %c0_79] : memref<3x1x32xf32, #tpu.memory_space<vmem>>, vector<1x1x32xf32>
    %210 = vector.shape_cast %209 : vector<1x1x32xf32> to vector<1x32xf32>
    %211 = vector.broadcast %210 : vector<1x32xf32> to vector<16x32xf32>
    %212 = arith.addf %208, %211 : vector<16x32xf32>
    %213 = vector.shape_cast %212 : vector<16x32xf32> to vector<2x1x8x32xf32>
    %c0_80 = arith.constant 0 : index
    %c1_81 = arith.constant 1 : index
    %c0_82 = arith.constant 0 : index
    %c0_83 = arith.constant 0 : index
    %214 = vector.load %arg6[%c0_80, %c1_81, %c0_82, %c0_83] : memref<2x3x8x32xf32, #tpu.memory_space<vmem>>, vector<2x1x8x32xf32>
    tpu.vector_store %arg6[%c0_80, %c1_81, %c0_82, %c0_83], %213 {strides = array<i32>} : memref<2x3x8x32xf32, #tpu.memory_space<vmem>>, vector<2x1x8x32xf32>,
    %c2_84 = arith.constant 2 : index
    %c0_85 = arith.constant 0 : index
    %c0_86 = arith.constant 0 : index
    %215 = vector.load %arg4[%c2_84, %c0_85, %c0_86] : memref<3x32x32xf32, #tpu.memory_space<vmem>>, vector<1x32x32xf32>
    %216 = vector.shape_cast %215 : vector<1x32x32xf32> to vector<32x32xf32>
    %217 = vector.extract_strided_slice %14 {offsets = [0, 0, 0], sizes = [2, 8, 8], strides = [1, 1, 1]} : vector<2x8x32xf32> to vector<2x8x8xf32>
    %218 = vector.extract_strided_slice %31 {offsets = [0, 0, 0], sizes = [2, 8, 8], strides = [1, 1, 1]} : vector<2x8x32xf32> to vector<2x8x8xf32>
    "tpu.trace_start"() <{level = 10 : i32, message = "bqd,bkd->bqk"}> : () -> ()
    %cst_87 = arith.constant dense<0.000000e+00> : vector<2x8x8xf32>
    %219 = tpu.matmul %217, %218, %cst_87 {dimension_numbers = #tpu.dot_dimension_numbers<[2], [2], [1], [1], [0, 0, 0, 1, 1, 1], [0], [0]>} : vector<2x8x8xf32>, vector<2x8x8xf32>, vector<2x8x8xf32> -> vector<2x8x8xf32>
    "tpu.trace_stop"() : () -> ()
    %cst_88 = arith.constant dense<0xFF800000> : vector<2x8xf32>
    %220 = vector.multi_reduction <maximumf>, %219, %cst_88 [2] : vector<2x8x8xf32> to vector<2x8xf32>
    %221 = vector.shape_cast %220 : vector<2x8xf32> to vector<2x8x1xf32>
    %222 = vector.broadcast %221 : vector<2x8x1xf32> to vector<2x8x8xf32>
    %223 = arith.subf %219, %222 : vector<2x8x8xf32>
    %224 = math.exp %223 : vector<2x8x8xf32>
    %cst_89 = arith.constant dense<0.000000e+00> : vector<2x8xf32>
    %225 = vector.multi_reduction <add>, %224, %cst_89 [2] : vector<2x8x8xf32> to vector<2x8xf32>
    %226 = vector.shape_cast %225 : vector<2x8xf32> to vector<2x8x1xf32>
    %227 = tpu.reciprocal %226 {approx = true} : vector<2x8x1xf32> -> vector<2x8x1xf32>
    %228 = vector.broadcast %227 : vector<2x8x1xf32> to vector<2x8x8xf32>
    %229 = arith.mulf %224, %228 : vector<2x8x8xf32>
    %230 = vector.extract_strided_slice %32 {offsets = [0, 0, 0], sizes = [2, 8, 8], strides = [1, 1, 1]} : vector<2x8x32xf32> to vector<2x8x8xf32>
    "tpu.trace_start"() <{level = 10 : i32, message = "bqk,bkd->bqd"}> : () -> ()
    %cst_90 = arith.constant dense<0.000000e+00> : vector<2x8x8xf32>
    %231 = tpu.matmul %229, %230, %cst_90 {dimension_numbers = #tpu.dot_dimension_numbers<[2], [1], [1], [2], [0, 0, 0, 1, 1, 2], [0], [0]>} : vector<2x8x8xf32>, vector<2x8x8xf32>, vector<2x8x8xf32> -> vector<2x8x8xf32>
    "tpu.trace_stop"() : () -> ()
    %232 = vector.shape_cast %231 : vector<2x8x8xf32> to vector<16x8xf32>
    %233 = vector.extract_strided_slice %216 {offsets = [0, 0], sizes = [8, 32], strides = [1, 1]} : vector<32x32xf32> to vector<8x32xf32>
    %cst_91 = arith.constant dense<0.000000e+00> : vector<16x32xf32>
    %234 = tpu.matmul %232, %233, %cst_91 {dimension_numbers = #tpu.dot_dimension_numbers<[1], [0], [0], [1], [0, 0, 1, 1], [], []>} : vector<16x8xf32>, vector<8x32xf32>, vector<16x32xf32> -> vector<16x32xf32>
    %235 = vector.extract_strided_slice %14 {offsets = [0, 0, 8], sizes = [2, 8, 8], strides = [1, 1, 1]} : vector<2x8x32xf32> to vector<2x8x8xf32>
    %236 = vector.extract_strided_slice %31 {offsets = [0, 0, 8], sizes = [2, 8, 8], strides = [1, 1, 1]} : vector<2x8x32xf32> to vector<2x8x8xf32>
    "tpu.trace_start"() <{level = 10 : i32, message = "bqd,bkd->bqk"}> : () -> ()
    %cst_92 = arith.constant dense<0.000000e+00> : vector<2x8x8xf32>
    %237 = tpu.matmul %235, %236, %cst_92 {dimension_numbers = #tpu.dot_dimension_numbers<[2], [2], [1], [1], [0, 0, 0, 1, 1, 1], [0], [0]>} : vector<2x8x8xf32>, vector<2x8x8xf32>, vector<2x8x8xf32> -> vector<2x8x8xf32>
    "tpu.trace_stop"() : () -> ()
    %cst_93 = arith.constant dense<0xFF800000> : vector<2x8xf32>
    %238 = vector.multi_reduction <maximumf>, %237, %cst_93 [2] : vector<2x8x8xf32> to vector<2x8xf32>
    %239 = vector.shape_cast %238 : vector<2x8xf32> to vector<2x8x1xf32>
    %240 = vector.broadcast %239 : vector<2x8x1xf32> to vector<2x8x8xf32>
    %241 = arith.subf %237, %240 : vector<2x8x8xf32>
    %242 = math.exp %241 : vector<2x8x8xf32>
    %cst_94 = arith.constant dense<0.000000e+00> : vector<2x8xf32>
    %243 = vector.multi_reduction <add>, %242, %cst_94 [2] : vector<2x8x8xf32> to vector<2x8xf32>
    %244 = vector.shape_cast %243 : vector<2x8xf32> to vector<2x8x1xf32>
    %245 = tpu.reciprocal %244 {approx = true} : vector<2x8x1xf32> -> vector<2x8x1xf32>
    %246 = vector.broadcast %245 : vector<2x8x1xf32> to vector<2x8x8xf32>
    %247 = arith.mulf %242, %246 : vector<2x8x8xf32>
    %248 = vector.extract_strided_slice %32 {offsets = [0, 0, 8], sizes = [2, 8, 8], strides = [1, 1, 1]} : vector<2x8x32xf32> to vector<2x8x8xf32>
    "tpu.trace_start"() <{level = 10 : i32, message = "bqk,bkd->bqd"}> : () -> ()
    %cst_95 = arith.constant dense<0.000000e+00> : vector<2x8x8xf32>
    %249 = tpu.matmul %247, %248, %cst_95 {dimension_numbers = #tpu.dot_dimension_numbers<[2], [1], [1], [2], [0, 0, 0, 1, 1, 2], [0], [0]>} : vector<2x8x8xf32>, vector<2x8x8xf32>, vector<2x8x8xf32> -> vector<2x8x8xf32>
    "tpu.trace_stop"() : () -> ()
    %250 = vector.shape_cast %249 : vector<2x8x8xf32> to vector<16x8xf32>
    %251 = vector.extract_strided_slice %216 {offsets = [8, 0], sizes = [8, 32], strides = [1, 1]} : vector<32x32xf32> to vector<8x32xf32>
    %cst_96 = arith.constant dense<0.000000e+00> : vector<16x32xf32>
    %252 = tpu.matmul %250, %251, %cst_96 {dimension_numbers = #tpu.dot_dimension_numbers<[1], [0], [0], [1], [0, 0, 1, 1], [], []>} : vector<16x8xf32>, vector<8x32xf32>, vector<16x32xf32> -> vector<16x32xf32>
    %253 = arith.addf %234, %252 : vector<16x32xf32>
    %254 = vector.extract_strided_slice %14 {offsets = [0, 0, 16], sizes = [2, 8, 8], strides = [1, 1, 1]} : vector<2x8x32xf32> to vector<2x8x8xf32>
    %255 = vector.extract_strided_slice %31 {offsets = [0, 0, 16], sizes = [2, 8, 8], strides = [1, 1, 1]} : vector<2x8x32xf32> to vector<2x8x8xf32>
    "tpu.trace_start"() <{level = 10 : i32, message = "bqd,bkd->bqk"}> : () -> ()
    %cst_97 = arith.constant dense<0.000000e+00> : vector<2x8x8xf32>
    %256 = tpu.matmul %254, %255, %cst_97 {dimension_numbers = #tpu.dot_dimension_numbers<[2], [2], [1], [1], [0, 0, 0, 1, 1, 1], [0], [0]>} : vector<2x8x8xf32>, vector<2x8x8xf32>, vector<2x8x8xf32> -> vector<2x8x8xf32>
    "tpu.trace_stop"() : () -> ()
    %cst_98 = arith.constant dense<0xFF800000> : vector<2x8xf32>
    %257 = vector.multi_reduction <maximumf>, %256, %cst_98 [2] : vector<2x8x8xf32> to vector<2x8xf32>
    %258 = vector.shape_cast %257 : vector<2x8xf32> to vector<2x8x1xf32>
    %259 = vector.broadcast %258 : vector<2x8x1xf32> to vector<2x8x8xf32>
    %260 = arith.subf %256, %259 : vector<2x8x8xf32>
    %261 = math.exp %260 : vector<2x8x8xf32>
    %cst_99 = arith.constant dense<0.000000e+00> : vector<2x8xf32>
    %262 = vector.multi_reduction <add>, %261, %cst_99 [2] : vector<2x8x8xf32> to vector<2x8xf32>
    %263 = vector.shape_cast %262 : vector<2x8xf32> to vector<2x8x1xf32>
    %264 = tpu.reciprocal %263 {approx = true} : vector<2x8x1xf32> -> vector<2x8x1xf32>
    %265 = vector.broadcast %264 : vector<2x8x1xf32> to vector<2x8x8xf32>
    %266 = arith.mulf %261, %265 : vector<2x8x8xf32>
    %267 = vector.extract_strided_slice %32 {offsets = [0, 0, 16], sizes = [2, 8, 8], strides = [1, 1, 1]} : vector<2x8x32xf32> to vector<2x8x8xf32>
    "tpu.trace_start"() <{level = 10 : i32, message = "bqk,bkd->bqd"}> : () -> ()
    %cst_100 = arith.constant dense<0.000000e+00> : vector<2x8x8xf32>
    %268 = tpu.matmul %266, %267, %cst_100 {dimension_numbers = #tpu.dot_dimension_numbers<[2], [1], [1], [2], [0, 0, 0, 1, 1, 2], [0], [0]>} : vector<2x8x8xf32>, vector<2x8x8xf32>, vector<2x8x8xf32> -> vector<2x8x8xf32>
    "tpu.trace_stop"() : () -> ()
    %269 = vector.shape_cast %268 : vector<2x8x8xf32> to vector<16x8xf32>
    %270 = vector.extract_strided_slice %216 {offsets = [16, 0], sizes = [8, 32], strides = [1, 1]} : vector<32x32xf32> to vector<8x32xf32>
    %cst_101 = arith.constant dense<0.000000e+00> : vector<16x32xf32>
    %271 = tpu.matmul %269, %270, %cst_101 {dimension_numbers = #tpu.dot_dimension_numbers<[1], [0], [0], [1], [0, 0, 1, 1], [], []>} : vector<16x8xf32>, vector<8x32xf32>, vector<16x32xf32> -> vector<16x32xf32>
    %272 = arith.addf %253, %271 : vector<16x32xf32>
    %273 = vector.extract_strided_slice %14 {offsets = [0, 0, 24], sizes = [2, 8, 8], strides = [1, 1, 1]} : vector<2x8x32xf32> to vector<2x8x8xf32>
    %274 = vector.extract_strided_slice %31 {offsets = [0, 0, 24], sizes = [2, 8, 8], strides = [1, 1, 1]} : vector<2x8x32xf32> to vector<2x8x8xf32>
    "tpu.trace_start"() <{level = 10 : i32, message = "bqd,bkd->bqk"}> : () -> ()
    %cst_102 = arith.constant dense<0.000000e+00> : vector<2x8x8xf32>
    %275 = tpu.matmul %273, %274, %cst_102 {dimension_numbers = #tpu.dot_dimension_numbers<[2], [2], [1], [1], [0, 0, 0, 1, 1, 1], [0], [0]>} : vector<2x8x8xf32>, vector<2x8x8xf32>, vector<2x8x8xf32> -> vector<2x8x8xf32>
    "tpu.trace_stop"() : () -> ()
    %cst_103 = arith.constant dense<0xFF800000> : vector<2x8xf32>
    %276 = vector.multi_reduction <maximumf>, %275, %cst_103 [2] : vector<2x8x8xf32> to vector<2x8xf32>
    %277 = vector.shape_cast %276 : vector<2x8xf32> to vector<2x8x1xf32>
    %278 = vector.broadcast %277 : vector<2x8x1xf32> to vector<2x8x8xf32>
    %279 = arith.subf %275, %278 : vector<2x8x8xf32>
    %280 = math.exp %279 : vector<2x8x8xf32>
    %cst_104 = arith.constant dense<0.000000e+00> : vector<2x8xf32>
    %281 = vector.multi_reduction <add>, %280, %cst_104 [2] : vector<2x8x8xf32> to vector<2x8xf32>
    %282 = vector.shape_cast %281 : vector<2x8xf32> to vector<2x8x1xf32>
    %283 = tpu.reciprocal %282 {approx = true} : vector<2x8x1xf32> -> vector<2x8x1xf32>
    %284 = vector.broadcast %283 : vector<2x8x1xf32> to vector<2x8x8xf32>
    %285 = arith.mulf %280, %284 : vector<2x8x8xf32>
    %286 = vector.extract_strided_slice %32 {offsets = [0, 0, 24], sizes = [2, 8, 8], strides = [1, 1, 1]} : vector<2x8x32xf32> to vector<2x8x8xf32>
    "tpu.trace_start"() <{level = 10 : i32, message = "bqk,bkd->bqd"}> : () -> ()
    %cst_105 = arith.constant dense<0.000000e+00> : vector<2x8x8xf32>
    %287 = tpu.matmul %285, %286, %cst_105 {dimension_numbers = #tpu.dot_dimension_numbers<[2], [1], [1], [2], [0, 0, 0, 1, 1, 2], [0], [0]>} : vector<2x8x8xf32>, vector<2x8x8xf32>, vector<2x8x8xf32> -> vector<2x8x8xf32>
    "tpu.trace_stop"() : () -> ()
    %288 = vector.shape_cast %287 : vector<2x8x8xf32> to vector<16x8xf32>
    %289 = vector.extract_strided_slice %216 {offsets = [24, 0], sizes = [8, 32], strides = [1, 1]} : vector<32x32xf32> to vector<8x32xf32>
    %cst_106 = arith.constant dense<0.000000e+00> : vector<16x32xf32>
    %290 = tpu.matmul %288, %289, %cst_106 {dimension_numbers = #tpu.dot_dimension_numbers<[1], [0], [0], [1], [0, 0, 1, 1], [], []>} : vector<16x8xf32>, vector<8x32xf32>, vector<16x32xf32> -> vector<16x32xf32>
    %291 = arith.addf %272, %290 : vector<16x32xf32>
    %c2_107 = arith.constant 2 : index
    %c0_108 = arith.constant 0 : index
    %c0_109 = arith.constant 0 : index
    %292 = vector.load %arg5[%c2_107, %c0_108, %c0_109] : memref<3x1x32xf32, #tpu.memory_space<vmem>>, vector<1x1x32xf32>
    %293 = vector.shape_cast %292 : vector<1x1x32xf32> to vector<1x32xf32>
    %294 = vector.broadcast %293 : vector<1x32xf32> to vector<16x32xf32>
    %295 = arith.addf %291, %294 : vector<16x32xf32>
    %296 = vector.shape_cast %295 : vector<16x32xf32> to vector<2x1x8x32xf32>
    %c0_110 = arith.constant 0 : index
    %c2_111 = arith.constant 2 : index
    %c0_112 = arith.constant 0 : index
    %c0_113 = arith.constant 0 : index
    %297 = vector.load %arg6[%c0_110, %c2_111, %c0_112, %c0_113] : memref<2x3x8x32xf32, #tpu.memory_space<vmem>>, vector<2x1x8x32xf32>
    tpu.vector_store %arg6[%c0_110, %c2_111, %c0_112, %c0_113], %296 {strides = array<i32>} : memref<2x3x8x32xf32, #tpu.memory_space<vmem>>, vector<2x1x8x32xf32>,
    return
  }
  func.func @transform_0(%arg0: i32) -> (i32, i32, i32, i32) {
    %c0_i32 = arith.constant 0 : i32
    %c0_i32_0 = arith.constant 0 : i32
    %c0_i32_1 = arith.constant 0 : i32
    %c0_i32_2 = arith.constant 0 : i32
    return %arg0, %c0_i32, %c0_i32_0, %c0_i32_1 : i32, i32, i32, i32
  }
  func.func @transform_1(%arg0: i32) -> (i32, i32, i32) {
    %c0_i32 = arith.constant 0 : i32
    %c0_i32_0 = arith.constant 0 : i32
    %c0_i32_1 = arith.constant 0 : i32
    %c0_i32_2 = arith.constant 0 : i32
    return %c0_i32, %c0_i32_0, %c0_i32_1 : i32, i32, i32
  }
  func.func @transform_2(%arg0: i32) -> (i32, i32, i32) {
    %c0_i32 = arith.constant 0 : i32
    %c0_i32_0 = arith.constant 0 : i32
    %c0_i32_1 = arith.constant 0 : i32
    %c0_i32_2 = arith.constant 0 : i32
    return %c0_i32, %c0_i32_0, %c0_i32_1 : i32, i32, i32
  }
  func.func @transform_3(%arg0: i32) -> (i32, i32, i32) {
    %c0_i32 = arith.constant 0 : i32
    %c0_i32_0 = arith.constant 0 : i32
    %c0_i32_1 = arith.constant 0 : i32
    %c0_i32_2 = arith.constant 0 : i32
    return %c0_i32, %c0_i32_0, %c0_i32_1 : i32, i32, i32
  }
  func.func @transform_4(%arg0: i32) -> (i32, i32, i32) {
    %c0_i32 = arith.constant 0 : i32
    %c0_i32_0 = arith.constant 0 : i32
    %c0_i32_1 = arith.constant 0 : i32
    %c0_i32_2 = arith.constant 0 : i32
    return %c0_i32, %c0_i32_0, %c0_i32_1 : i32, i32, i32
  }
  func.func @transform_5(%arg0: i32) -> (i32, i32, i32, i32) {
    %c0_i32 = arith.constant 0 : i32
    %c0_i32_0 = arith.constant 0 : i32
    %c0_i32_1 = arith.constant 0 : i32
    %c0_i32_2 = arith.constant 0 : i32
    return %arg0, %c0_i32, %c0_i32_0, %c0_i32_1 : i32, i32, i32, i32
  }
}

</mosaic_0001>

<bundles_post_ra>
// kernel: tpu_custom_call.1
= control target key start
LH: loop header
LB: loop body
LE: loop exit
PB: predicated region body
PF: predicated region fallthrough
CT: control target
= control target key end

     0   :  { %10 = vsyncpa [#allocation3], 0  ;;  %s6778_s0 = inlined_call_operand.hbm [shape: f32[2,3,8,32], index: 0, kind: input, shape index: {}]   ;;  %s6779_s1 = inlined_call_operand.hbm [shape: f32[3,32,96], index: 1, kind: input, shape index: {}]   ;;  %s6780_s2 = inlined_call_operand.vmem [shape: f32[3,1,96], index: 2, kind: input, shape index: {}]   ;;  %s6781_s3 = inlined_call_operand.hbm [shape: f32[3,32,32], index: 3, kind: input, shape index: {}]   ;;  %s6782_s4 = inlined_call_operand.vmem [shape: f32[3,1,32], index: 4, kind: input, shape index: {}]   ;;  %s6783_s5 = inlined_call_operand.hbm [shape: f32[2,3,8,32], index: 5, kind: output, shape index: {}]  }
   0x1   :  { %11 = vsyncpa [#allocation6], 0 }
   0x2   :  { %12 = vsyncpa [#allocation4], 0  ;;  %s6165_s18 = smov [#allocation5]   ;;  %s6166_s20 = smov [#allocation2]  }
   0x3   :  { %s30_s19 = sshll.u32 %s6165_s18, 4  ;;  %s18_s21 = sshll.u32 %s6166_s20, 4  ;;  %s31_s19 = int_to_ptr.vmem [resolvable:$true] %s30_s19  ;;  %s19_s21 = int_to_ptr.vmem [resolvable:$true] %s18_s21 }
   0x4   :  { %s6087_s22 = scalar_lea.vmem %s31_s19, 1536  ;;  %p6092_p1 = scmp.lt.s32.totalorder %s31_s19, %s31_s19 }
   0x5   :  { %p6088_p0 = scmp.ne.s32.totalorder %s31_s19, %s6087_s22  ;;  %p6093_p2 = scmp.lt.s32.totalorder %s6087_s22, %s6087_s22 }
   0x7   :  { %p6094_p3 = por %p6093_p2, %p6092_p1 }
   0x9   :  { %p6095_p4 = pnand %p6094_p3, %p6088_p0 }
   0xb   :  { %6098 = shalt.err (!%p6095_p4)
}
   0xc   :  { %s6167_s23 = smov 128   ;;  %s6168_s24 = smov 8  }
   0xd   :  { %36 = dma.hbm_to_vmem [thread:$0]  %s6779_s1, 1536, %s31_s19, [#allocation6], %s6167_s23, %s6167_s23, %s6168_s24  }
   0xe   :  { %s6107_s27 = scalar_lea.vmem %s19_s21, 768  ;;  %p6112_p6 = scmp.lt.s32.totalorder %s19_s21, %s19_s21 }
   0xf   :  { %p6108_p5 = scmp.ne.s32.totalorder %s19_s21, %s6107_s27  ;;  %p6113_p7 = scmp.lt.s32.totalorder %s6107_s27, %s6107_s27 }
  0x11   :  { %p6114_p8 = por %p6113_p7, %p6112_p6 }
  0x13   :  { %p6115_p9 = pnand %p6114_p8, %p6108_p5 }
  0x15   :  { %6118 = shalt.err (!%p6115_p9)
}
  0x16   :  { %24 = dma.hbm_to_vmem [thread:$0]  %s6778_s0, 768, %s19_s21, [#allocation3], %s6167_s23, %s6167_s23, %s6168_s24  }
  0x17   :  { %s6169_s30 = smov [#allocation7]  }
  0x18   :  { %s44_s6 = sshll.u32 %s6169_s30, 4  ;;  %s45_s6 = int_to_ptr.vmem [resolvable:$true] %s44_s6 }
  0x19   :  { %s6127_s7 = scalar_lea.vmem %s45_s6, 1536  ;;  %p6132_p11 = scmp.lt.s32.totalorder %s45_s6, %s45_s6 }
  0x1a   :  { %p6128_p10 = scmp.ne.s32.totalorder %s45_s6, %s6127_s7  ;;  %p6133_p12 = scmp.lt.s32.totalorder %s6127_s7, %s6127_s7 }
  0x1c   :  { %p6134_p13 = por %p6133_p12, %p6132_p11 }
  0x1e   :  { %p6135_p0 = pnand %p6134_p13, %p6128_p10 }
  0x20   :  { %6138 = shalt.err (!%p6135_p0)
}
  0x21   :  { %50 = dma.hbm_to_vmem [thread:$0]  %s6781_s3, 1536, %s45_s6, [#allocation6], %s6167_s23, %s6167_s23, %s6168_s24  }
  0x22   :  { %6159 = dma.done.wait [#allocation3], 768  }
  0x23   :  { %6160 = vsyncadd [#allocation3], 4294966528 }
  0x24   :  { %6161 = dma.done.wait [#allocation6], 3072  }
  0x25   :  { %6162 = vsyncadd [#allocation6], 4294964224  ;;  %vm79_vm0 = vcmask 261120   ;;  %v71_v0 = vld [vmem:[#allocation5 + $0x18] sm:$0xff]  ;;  %v70_v1 = vld [vmem:[#allocation5 + $0x10] sm:$0xff]  ;;  %v6170_v18 = vmov 0.0  }
  0x26   :  { %5631 = vmatprep.subr.mxu0 %v71_v0  ;;  %v62_v2 = vld [vmem:[#allocation2] sm:$0xff]  ;;  %v69_v3 = vld [vmem:[#allocation5 + $0x8] sm:$0xff]  ;;  %v68_v4 = vld [vmem:[#allocation5] sm:$0xff]  ;;  %vm6171_vm1 = vmmov 0   ;;  %s6172_s9 = smov 96   ;;  %vm362_vm2 = vcmask 64512  }
  0x27   :  { %5632 = vmatpush3.msra.mxu0 %v71_v0  ;;  %5639 = vmatprep.mubr.msk.f32.mxu0 %vm79_vm0, %v62_v2  ;;  %v167_v5 = vld [vmem:[#allocation5 + $0x38] sm:$0xff]  ;;  %v166_v6 = vld [vmem:[#allocation5 + $0x30] sm:$0xff]  ;;  %v65_v7 = vld [vmem:[#allocation2 + $0x18] sm:$0xff]  ;;  %s6173_s12 = smov 64   ;;  %s6174_s13 = smov 88  }
  0x28   :  { %5633 = vmatprep.subr.mxu0 %v70_v1  ;;  %5642 = vmatprep.subr.mxu1 %v167_v5  ;;  %v263_v8 = vld [vmem:[#allocation5 + $0x58] sm:$0xff]  ;;  %v64_v9 = vld [vmem:[#allocation2 + $0x10] sm:$0xff]  ;;  %v262_v10 = vld [vmem:[#allocation5 + $0x50] sm:$0xff]  ;;  %s6175_s14 = smov 120   ;;  %s6176_s15 = smov 56  }
  0x29   :  { %5634 = vmatpush3.msra.mxu0 %v70_v1  ;;  %5643 = vmatpush3.msra.mxu1 %v167_v5  ;;  %v165_v11 = vld [vmem:[#allocation5 + $0x28] sm:$0xff]  ;;  %v164_v13 = vld [vmem:[#allocation5 + $0x20] sm:$0xff]  ;;  %v63_v15 = vld [vmem:[#allocation2 + $0x8] sm:$0xff]  ;;  %s6177_s16 = smov 112   ;;  %s6178_s17 = smov 80  }
  0x2a   :  { %5635 = vmatprep.subr.mxu0 %v69_v3  ;;  %5644 = vmatprep.subr.mxu1 %v166_v6  ;;  %v261_v12 = vld [vmem:[#allocation5 + $0x48] sm:$0xff]  ;;  %v260_v14 = vld [vmem:[#allocation5 + $0x40] sm:$0xff]  ;;  %v66_v16 = vld [vmem:[#allocation2 + $0x20] sm:$0xff]  ;;  %s6179_s18 = smov 48   ;;  %s6180_s19 = smov 72  }
  0x2b   :  { %5636 = vmatpush3.msra.mxu0 %v69_v3  ;;  %5645 = vmatpush3.msra.mxu1 %v166_v6  ;;  %v67_v17 = vld [vmem:[#allocation2 + $0x28] sm:$0xff]  ;;  %v5377_v22 = vld [vmem:[%s6780_s2 + $0x2] ss:$0 sm:$0xff]  ;;  %v5373_v27 = vld [vmem:[%s6780_s2 + $0x1] ss:$0 sm:$0xff]  ;;  %s6181_s20 = smov 104  }
  0x2c   :  { %5637 = vmatprep.subr.mxu0 %v68_v4  ;;  %5646 = vmatprep.subr.mxu1 %v165_v11  ;;  %s6182_s25 = smov 40   ;;  %s6183_s6 = smov [#allocation8]  }
  0x2d   :  { %5638 = vmatpush3.msra.mxu0 %v68_v4  ;;  %5647 = vmatpush3.msra.mxu1 %v165_v11  ;;  %s5356_s7 = sshll.u32 %s6183_s6, 4  ;;  %s5357_s7 = int_to_ptr.vmem [resolvable:$true] %s5356_s7 }
  0x2e   :  { %5640 = vmatmul.mubr.msk.f32.vlgmr.msra.gmra.mxu0 %vm79_vm0, %v65_v7  ;;  %5653 = vmatprep.subr.mxu0 %v263_v8  ;;  %s6139_s1 = scalar_lea.vmem %s5357_s7, 768  ;;  %p6144_p2 = scmp.lt.s32.totalorder %s5357_s7, %s5357_s7 }
  0x2f   :  { %5654 = vmatpush3.msra.mxu0 %v263_v8  ;;  %5661 = vmatprep.mubr.msk.f32.mxu0 %vm79_vm0, %v64_v9  ;;  %p6140_p1 = scmp.ne.s32.totalorder %s5357_s7, %s6139_s1  ;;  %p6145_p3 = scmp.lt.s32.totalorder %s6139_s1, %s6139_s1 }
  0x30   :  { %5655 = vmatprep.subr.mxu0 %v262_v10  ;;  %5648 = vmatprep.subr.mxu1 %v164_v13 }
  0x31   :  { %5656 = vmatpush3.msra.mxu0 %v262_v10  ;;  %5649 = vmatpush3.msra.mxu1 %v164_v13  ;;  %p6146_p4 = por %p6145_p3, %p6144_p2 }
  0x32   :  { %5657 = vmatprep.subr.mxu0 %v261_v12  ;;  %5650 = vmatprep.mubr.msk.f32.mxu1 %vm79_vm0, %v63_v15 }
  0x33   :  { %5658 = vmatpush3.msra.mxu0 %v261_v12  ;;  %5651 = vmatmul.mubr.msk.f32.vlgmr.msra.gmra.mxu1 %vm79_vm0, %v66_v16  ;;  %p6147_p5 = pnand %p6146_p4, %p6140_p1 }
  0x34   :  { %5659 = vmatprep.subr.mxu0 %v260_v14  ;;  %5664 = vmatprep.subr.mxu1 %v6170_v18 }
  0x35   :  { %5660 = vmatpush3.msra.mxu0 %v260_v14  ;;  %5666 = vmatprep.mubr.msk.f32.mxu1 %vm6171_vm1, %v6170_v18 }
  0x36   :  { %5662 = vmatmul.mubr.msk.f32.vlgmr.msra.gmra.mxu0 %vm79_vm0, %v67_v17  ;;  %5674 = vmatprep.subr.mxu0 %v6170_v18 }
  0x37   :  { %5676 = vmatprep.mubr.msk.f32.mxu0 %vm6171_vm1, %v6170_v18 }
  0xee   :  { %v6244_v19 = vpop.f32.mrf.mxu0 }
  0xf0   :  { %v6246_v20 = vpop.f32.mrf.mxu0 }
  0xf3   :  { %v5652_v26 = vpop.f32.mrf.mxu1 }
  0xf4   :  { %v6265_v31 = vadd.f32 %v5652_v26, %v5373_v27 }
  0xf5   :  { %v248_v28 = vpop.f32.mrf.mxu1 }
  0xf6   :  { %v5663_v21 = vpop.f32.mrf.mxu0  ;;  %v6262_v29 = vadd.f32 %v5373_v27, %v248_v28  ;;  %v6277_v34 = vmul.f32 0.17677669, %v6265_v31 }
  0xf7   :  { %v6255_v25 = vadd.f32 %v5663_v21, %v5377_v22 }
  0xf8   :  { %v344_v23 = vpop.f32.mrf.mxu0  ;;  %v6268_v32 = vmul.f32 0.17677669, %v6262_v29 }
  0xf9   :  { %v6251_v24 = vadd.f32 %v5377_v22, %v344_v23  ;;  %v355_v23 = vld [vmem:[#allocation7] sm:$0xff] }
  0xfb   :  { %360 = vrot.lane.b32.xlu0 %v6251_v24, %s6172_s9 }
  0xff   :  { %439 = vrot.lane.b32.xlu0 %v6255_v25, %s6172_s9 }
 0x16d   :  { %v361_v30 = vpop.permute.xlu0 %360 }
 0x16e   :  { %5665 = vmatpush3.xpose.msk.msra.mxu1 %vm362_vm2, %v361_v30 }
 0x16f   :  { %5669 = vmatprep.subr.mxu1 %v6170_v18 }
 0x171   :  { %5667 = vmatmul.mubr.msk.f32.vlgmr.msra.gmra.mxu1 %vm362_vm2, %v6268_v32  ;;  %v440_v33 = vpop.permute.xlu0 %439 }
 0x172   :  { %5670 = vmatpush3.xpose.msk.msra.mxu1 %vm362_vm2, %v440_v33  ;;  %5671 = vmatprep.mubr.msk.f32.mxu1 %vm6171_vm1, %v6170_v18 }
 0x173   :  { %5679 = vmatprep.subr.mxu1 %v6170_v18 }
 0x175   :  { %5672 = vmatmul.mubr.msk.f32.vlgmr.msra.gmra.mxu1 %vm362_vm2, %v6277_v34 }
 0x176   :  { %5681 = vmatprep.mubr.msk.f32.mxu1 %vm6171_vm1, %v6170_v18 }
 0x231   :  { %v434_v35 = vpop.f32.mrf.mxu1 }
 0x232   :  { %v516_v36 = vsel %vm362_vm2, %v434_v35, -inf }
 0x233   :  { %517 = vmax.xlane.f32.xlu1 %v516_v36  ;;  %v5668_v37 = vpop.f32.mrf.mxu1 }
 0x235   :  { %v512_v38 = vpop.f32.mrf.mxu1 }
 0x236   :  { %v519_v39 = vsel %vm362_vm2, %v512_v38, -inf }
 0x237   :  { %520 = vmax.xlane.f32.xlu1 %v519_v39  ;;  %v5673_v40 = vpop.f32.mrf.mxu1 }
 0x238   :  { %v356_v40 = vld [vmem:[#allocation7 + $0x8] sm:$0xff] }
 0x248   :  { %538 = vrot.lane.b32.xlu1 %v6251_v24, %s6173_s12 }
 0x24c   :  { %614 = vrot.lane.b32.xlu1 %v6255_v25, %s6173_s12 }
 0x250   :  { %692 = vrot.lane.b32.xlu1 %v6251_v24, %s6174_s13 }
 0x254   :  { %770 = vrot.lane.b32.xlu1 %v6255_v25, %s6174_s13 }
 0x2bc   :  { %v518_v41 = vpop.xlane.xlu1 %517 }
 0x2bd   :  { %v522_v42 = vsub.f32 %v434_v35, %v518_v41 }
 0x2bf   :  { %v524_v43 = vmul.f32 1.442695, %v522_v42 }
 0x2c0   :  { %v521_v44 = vpop.xlane.xlu1 %520 }
 0x2c1   :  { %5983 = vpow2.f32 %v524_v43  ;;  %v523_v45 = vsub.f32 %v512_v38, %v521_v44 }
 0x2c3   :  { %v526_v46 = vmul.f32 1.442695, %v523_v45 }
 0x2c4   :  { %v539_v47 = vpop.permute.xlu1 %538 }
 0x2c5   :  { %5985 = vpow2.f32 %v526_v46  ;;  %5675 = vmatpush3.msra.mxu0 %v539_v47 }
 0x2c6   :  { %5684 = vmatprep.subr.mxu0 %v6170_v18 }
 0x2c8   :  { %v615_v48 = vpop.permute.xlu1 %614 }
 0x2c9   :  { %5680 = vmatpush3.msra.mxu1 %v615_v48 }
 0x2ca   :  { %5689 = vmatprep.subr.mxu1 %v6170_v18 }
 0x2cc   :  { %v693_v53 = vpop.permute.xlu1 %692 }
 0x2ce   :  { %v5984_v49 = vpop.eup %5983 }
 0x2cf   :  { %v528_v50 = vsel %vm362_vm2, %v5984_v49, 0.0 }
 0x2d0   :  { %529 = vadd.xlane.f32.xlu0 %v528_v50  ;;  %v771_v54 = vpop.permute.xlu1 %770 }
 0x2d2   :  { %v5986_v51 = vpop.eup %5985 }
 0x2d3   :  { %v531_v52 = vsel %vm362_vm2, %v5986_v51, 0.0 }
 0x2d4   :  { %532 = vadd.xlane.f32.xlu1 %v531_v52 }
 0x2e5   :  { %768 = vrot.lane.b32.xlu1 %v6277_v34, %s6175_s14 }
 0x2e6   :  { %690 = vrot.lane.b32.xlu0 %v6268_v32, %s6175_s14 }
 0x359   :  { %v530_v55 = vpop.xlane.xlu0 %529 }
 0x35a   :  { %5987 = vrcp.f32 %v530_v55 }
 0x35d   :  { %v533_v56 = vpop.xlane.xlu1 %532  ;;  %v691_v61 = vpop.permute.xlu0 %690 }
 0x35e   :  { %5989 = vrcp.f32 %v533_v56 }
 0x361   :  { %v769_v62 = vpop.permute.xlu1 %768 }
 0x367   :  { %v5988_v57 = vpop.eup %5987 }
 0x368   :  { %v536_v58 = vmul.f32 %v5988_v57, %v5984_v49 }
 0x36a   :  { %5677 = vmatmul.mubr.msk.f32.vlgmr.msra.gmra.mxu0 %vm362_vm2, %v536_v58 }
 0x36b   :  { %v5990_v59 = vpop.eup %5989  ;;  %5685 = vmatpush3.xpose.msk.msra.mxu0 %vm362_vm2, %v693_v53  ;;  %5686 = vmatprep.mubr.msk.f32.mxu0 %vm6171_vm1, %v6170_v18 }
 0x36c   :  { %v537_v60 = vmul.f32 %v5990_v59, %v5986_v51  ;;  %5694 = vmatprep.subr.mxu0 %v6170_v18 }
 0x36e   :  { %5682 = vmatmul.mubr.msk.f32.vlgmr.msra.gmra.mxu1 %vm362_vm2, %v537_v60  ;;  %5687 = vmatmul.mubr.msk.f32.vlgmr.msra.gmra.mxu0 %vm362_vm2, %v691_v61 }
 0x36f   :  { %5690 = vmatpush3.xpose.msk.msra.mxu1 %vm362_vm2, %v771_v54  ;;  %5691 = vmatprep.mubr.msk.f32.mxu1 %vm6171_vm1, %v6170_v18 }
 0x370   :  { %5699 = vmatprep.subr.mxu1 %v6170_v18  ;;  %5696 = vmatprep.mubr.msk.f32.mxu0 %vm6171_vm1, %v6170_v18 }
 0x372   :  { %5692 = vmatmul.mubr.msk.f32.vlgmr.msra.gmra.mxu1 %vm362_vm2, %v769_v62 }
 0x373   :  { %5701 = vmatprep.mubr.msk.f32.mxu1 %vm6171_vm1, %v6170_v18 }
 0x42a   :  { %v610_v63 = vpop.f32.mrf.mxu0 }
 0x42c   :  { %v5678_v0 = vpop.f32.mrf.mxu0 }
 0x42e   :  { %v686_v1 = vpop.f32.mrf.mxu1  ;;  %v764_v2 = vpop.f32.mrf.mxu0 }
 0x42f   :  { %v846_v3 = vsel %vm362_vm2, %v764_v2, -inf }
 0x430   :  { %v5683_v4 = vpop.f32.mrf.mxu1  ;;  %847 = vmax.xlane.f32.xlu1 %v846_v3  ;;  %v5688_v5 = vpop.f32.mrf.mxu0 }
 0x432   :  { %v842_v6 = vpop.f32.mrf.mxu1 }
 0x433   :  { %v849_v7 = vsel %vm362_vm2, %v842_v6, -inf }
 0x434   :  { %850 = vmax.xlane.f32.xlu0 %v849_v7  ;;  %v5693_v8 = vpop.f32.mrf.mxu1 }
 0x44a   :  { %944 = vrot.lane.b32.xlu0 %v6255_v25, %s6176_s15 }
 0x44e   :  { %1182 = vrot.lane.b32.xlu0 %v6268_v32, %s6177_s16 }
 0x4b9   :  { %v848_v9 = vpop.xlane.xlu1 %847 }
 0x4ba   :  { %v852_v10 = vsub.f32 %v764_v2, %v848_v9 }
 0x4bc   :  { %v854_v11 = vmul.f32 1.442695, %v852_v10  ;;  %v357_v10 = vld [vmem:[#allocation7 + $0x10] sm:$0xff] }
 0x4bd   :  { %v851_v12 = vpop.xlane.xlu0 %850 }
 0x4be   :  { %5991 = vpow2.f32 %v854_v11  ;;  %v853_v13 = vsub.f32 %v842_v6, %v851_v12 }
 0x4c0   :  { %v856_v14 = vmul.f32 1.442695, %v853_v13 }
 0x4c1   :  { %v945_v15 = vpop.permute.xlu0 %944 }
 0x4c2   :  { %5993 = vpow2.f32 %v856_v14  ;;  %5700 = vmatpush3.msra.mxu1 %v945_v15 }
 0x4c3   :  { %5709 = vmatprep.subr.mxu1 %v355_v23 }
 0x4c5   :  { %v1183_v45 = vpop.permute.xlu0 %1182 }
 0x4cb   :  { %v5992_v16 = vpop.eup %5991 }
 0x4cc   :  { %v858_v17 = vsel %vm362_vm2, %v5992_v16, 0.0 }
 0x4cd   :  { %859 = vadd.xlane.f32.xlu1 %v858_v17 }
 0x4cf   :  { %v5994_v21 = vpop.eup %5993 }
 0x4d0   :  { %v861_v22 = vsel %vm362_vm2, %v5994_v21, 0.0 }
 0x4d1   :  { %862 = vadd.xlane.f32.xlu1 %v861_v22 }
 0x4e2   :  { %868 = vrot.lane.b32.xlu1 %v6251_v24, %s6176_s15 }
 0x4e6   :  { %1184 = vrot.lane.b32.xlu1 %v6251_v24, %s6178_s17 }
 0x4ea   :  { %1262 = vrot.lane.b32.xlu1 %v6255_v25, %s6178_s17 }
 0x4ee   :  { %1260 = vrot.lane.b32.xlu1 %v6277_v34, %s6177_s16 }
 0x556   :  { %v860_v26 = vpop.xlane.xlu1 %859 }
 0x557   :  { %5995 = vrcp.f32 %v860_v26 }
 0x55a   :  { %v863_v27 = vpop.xlane.xlu1 %862 }
 0x55b   :  { %5997 = vrcp.f32 %v863_v27 }
 0x55e   :  { %v869_v28 = vpop.permute.xlu1 %868 }
 0x55f   :  { %5695 = vmatpush3.msra.mxu0 %v869_v28 }
 0x560   :  { %5704 = vmatprep.subr.mxu0 %v356_v40 }
 0x562   :  { %v1185_v35 = vpop.permute.xlu1 %1184 }
 0x564   :  { %v5996_v30 = vpop.eup %5995 }
 0x565   :  { %v866_v33 = vmul.f32 %v5996_v30, %v5992_v16 }
 0x566   :  { %v1263_v38 = vpop.permute.xlu1 %1262 }
 0x567   :  { %5697 = vmatmul.mubr.msk.f32.vlgmr.msra.gmra.mxu0 %vm362_vm2, %v866_v33 }
 0x568   :  { %v5998_v36 = vpop.eup %5997  ;;  %5705 = vmatpush3.msra.mxu0 %v356_v40 }
 0x569   :  { %v867_v37 = vmul.f32 %v5998_v36, %v5994_v21  ;;  %5714 = vmatprep.subr.mxu0 %v6170_v18 }
 0x56a   :  { %v1261_v39 = vpop.permute.xlu1 %1260 }
 0x56b   :  { %5702 = vmatmul.mubr.msk.f32.vlgmr.msra.gmra.mxu1 %vm362_vm2, %v867_v37 }
 0x56c   :  { %5711 = vmatprep.mubr.msk.f32.mxu1 %vm362_vm2, %v610_v63  ;;  %5710 = vmatpush3.msra.mxu1 %v355_v23 }
 0x56d   :  { %5719 = vmatprep.subr.mxu1 %v6170_v18 }
 0x56f   :  { %5712 = vmatmul.mubr.msk.f32.vlgmr.msra.gmra.mxu1 %vm362_vm2, %v686_v1 }
 0x570   :  { %5720 = vmatpush3.xpose.msk.msra.mxu1 %vm362_vm2, %v1263_v38  ;;  %5721 = vmatprep.mubr.msk.f32.mxu1 %vm6171_vm1, %v6170_v18 }
 0x571   :  { %5729 = vmatprep.subr.mxu1 %v6170_v18 }
 0x573   :  { %5722 = vmatmul.mubr.msk.f32.vlgmr.msra.gmra.mxu1 %vm362_vm2, %v1261_v39 }
 0x574   :  { %5731 = vmatprep.mubr.msk.f32.mxu1 %vm6171_vm1, %v6170_v18 }
 0x627   :  { %v940_v41 = vpop.f32.mrf.mxu0 }
 0x628   :  { %5706 = vmatprep.mubr.msk.f32.mxu0 %vm362_vm2, %v940_v41 }
 0x629   :  { %v5698_v42 = vpop.f32.mrf.mxu0 }
 0x62b   :  { %v1016_v43 = vpop.f32.mrf.mxu1 }
 0x62c   :  { %5707 = vmatmul.mubr.msk.f32.vlgmr.msra.gmra.mxu0 %vm362_vm2, %v1016_v43  ;;  %v5369_v43 = vld [vmem:[%s6780_s2] ss:$0 sm:$0xff] }
 0x62d   :  { %5715 = vmatpush3.xpose.msk.msra.mxu0 %vm362_vm2, %v1185_v35  ;;  %v5703_v44 = vpop.f32.mrf.mxu1  ;;  %5716 = vmatprep.mubr.msk.f32.mxu0 %vm6171_vm1, %v6170_v18 }
 0x62e   :  { %5724 = vmatprep.subr.mxu0 %v6170_v18  ;;  %v6417_v44 = vadd.f32 %v5369_v43, %v6246_v20 }
 0x62f   :  { %v6353_v46 = vpop.f32.mrf.mxu1 }
 0x630   :  { %5717 = vmatmul.mubr.msk.f32.vlgmr.msra.gmra.mxu0 %vm362_vm2, %v1183_v45  ;;  %v6422_v45 = vadd.f32 %v6244_v19, %v5369_v43  ;;  %v358_v19 = vld [vmem:[#allocation7 + $0x18] sm:$0xff] }
 0x631   :  { %v6356_v47 = vpop.f32.mrf.mxu1  ;;  %5726 = vmatprep.mubr.msk.f32.mxu0 %vm6171_vm1, %v6170_v18 }
 0x633   :  { %v1334_v48 = vpop.f32.mrf.mxu1 }
 0x634   :  { %v1341_v49 = vsel %vm362_vm2, %v1334_v48, -inf }
 0x635   :  { %1342 = vmax.xlane.f32.xlu1 %v1341_v49  ;;  %v5723_v50 = vpop.f32.mrf.mxu1 }
 0x646   :  { %1360 = vrot.lane.b32.xlu1 %v6251_v24, %s6179_s18 }
 0x64a   :  { %1597 = vrot.lane.b32.xlu1 %v6251_v24, %s6180_s19 }
 0x64e   :  { %1675 = vrot.lane.b32.xlu1 %v6255_v25, %s6180_s19 }
 0x652   :  { %1673 = vrot.lane.b32.xlu1 %v6277_v34, %s6181_s20 }
 0x6be   :  { %v1343_v51 = vpop.xlane.xlu1 %1342 }
 0x6bf   :  { %v1345_v53 = vsub.f32 %v1334_v48, %v1343_v51 }
 0x6c1   :  { %v1348_v54 = vmul.f32 1.442695, %v1345_v53 }
 0x6c2   :  { %v1361_v52 = vpop.permute.xlu1 %1360 }
 0x6c3   :  { %5725 = vmatpush3.msra.mxu0 %v1361_v52  ;;  %5999 = vpow2.f32 %v1348_v54 }
 0x6c4   :  { %5734 = vmatprep.subr.mxu0 %v357_v10 }
 0x6c6   :  { %v1598_v7 = vpop.permute.xlu1 %1597 }
 0x6ca   :  { %v1676_v16 = vpop.permute.xlu1 %1675 }
 0x6ce   :  { %v1674_v22 = vpop.permute.xlu1 %1673 }
 0x6d0   :  { %v6000_v59 = vpop.eup %5999 }
 0x6d1   :  { %v1353_v61 = vsel %vm362_vm2, %v6000_v59, 0.0 }
 0x6ec   :  { %v6369_v55 = vpop.f32.mrf.mxu0 }
 0x6ed   :  { %v1179_v33 = vadd.f32 %v6353_v46, %v6369_v55 }
 0x6ee   :  { %v6371_v56 = vpop.f32.mrf.mxu0 }
 0x6ef   :  { %v1174_v36 = vadd.f32 %v6356_v47, %v6371_v56 }
 0x6f0   :  { %v1256_v57 = vpop.f32.mrf.mxu0 }
 0x6f1   :  { %v1338_v58 = vsel %vm362_vm2, %v1256_v57, -inf }
 0x6f2   :  { %1339 = vmax.xlane.f32.xlu0 %v1338_v58  ;;  %v5718_v60 = vpop.f32.mrf.mxu0 }
 0x6f6   :  { %1354 = vadd.xlane.f32.xlu0 %v1353_v61 }
 0x77b   :  { %v1340_v34 = vpop.xlane.xlu0 %1339 }
 0x77c   :  { %v1344_v62 = vsub.f32 %v1256_v57, %v1340_v34 }
 0x77e   :  { %v1346_v63 = vmul.f32 1.442695, %v1344_v62 }
 0x77f   :  { %v1355_v2 = vpop.xlane.xlu0 %1354 }
 0x780   :  { %6001 = vpow2.f32 %v1346_v63  ;;  %v6450_v63 = vmul.f32 0.17677669, %v6255_v25 }
 0x781   :  { %6003 = vrcp.f32 %v1355_v2 }
 0x78d   :  { %v6002_v0 = vpop.eup %6001 }
 0x78e   :  { %v1350_v1 = vsel %vm362_vm2, %v6002_v0, 0.0  ;;  %v6004_v4 = vpop.eup %6003 }
 0x78f   :  { %1351 = vadd.xlane.f32.xlu0 %v1350_v1  ;;  %v1359_v6 = vmul.f32 %v6004_v4, %v6000_v59  ;;  %v6437_v59 = vmul.f32 0.17677669, %v6251_v24 }
 0x7a5   :  { %1436 = vrot.lane.b32.xlu0 %v6255_v25, %s6179_s18 }
 0x7a9   :  { %1595 = vrot.lane.b32.xlu0 %v6268_v32, %s6181_s20 }
 0x818   :  { %v1352_v3 = vpop.xlane.xlu0 %1351 }
 0x819   :  { %6005 = vrcp.f32 %v1352_v3 }
 0x81c   :  { %v1437_v5 = vpop.permute.xlu0 %1436 }
 0x81d   :  { %5730 = vmatpush3.msra.mxu1 %v1437_v5 }
 0x81e   :  { %5732 = vmatmul.mubr.msk.f32.vlgmr.msra.gmra.mxu1 %vm362_vm2, %v1359_v6  ;;  %5739 = vmatprep.subr.mxu1 %v6170_v18 }
 0x81f   :  { %5740 = vmatpush3.xpose.msk.msra.mxu1 %vm362_vm2, %v1598_v7  ;;  %5741 = vmatprep.mubr.msk.f32.mxu1 %vm6171_vm1, %v6170_v18 }
 0x820   :  { %v1596_v8 = vpop.permute.xlu0 %1595  ;;  %5749 = vmatprep.subr.mxu1 %v6170_v18 }
 0x822   :  { %5742 = vmatmul.mubr.msk.f32.vlgmr.msra.gmra.mxu1 %vm362_vm2, %v1596_v8  ;;  %v5412_v8 = vld [vmem:[%s6782_s4] ss:$0 sm:$0xff] }
 0x823   :  { %5751 = vmatprep.mubr.msk.f32.mxu1 %vm6171_vm1, %v6170_v18 }
 0x826   :  { %v6006_v32 = vpop.eup %6005 }
 0x827   :  { %v1358_v9 = vmul.f32 %v6006_v32, %v6002_v0 }
 0x829   :  { %5727 = vmatmul.mubr.msk.f32.vlgmr.msra.gmra.mxu0 %vm362_vm2, %v1358_v9 }
 0x82a   :  { %5735 = vmatpush3.msra.mxu0 %v357_v10 }
 0x82b   :  { %5744 = vmatprep.subr.mxu0 %v6170_v18 }
 0x8de   :  { %v1508_v11 = vpop.f32.mrf.mxu1 }
 0x8e0   :  { %v5733_v12 = vpop.f32.mrf.mxu1 }
 0x8e2   :  { %v1669_v13 = vpop.f32.mrf.mxu1 }
 0x8e3   :  { %v1751_v14 = vsel %vm362_vm2, %v1669_v13, -inf }
 0x8e4   :  { %1752 = vmax.xlane.f32.xlu0 %v1751_v14  ;;  %v5743_v15 = vpop.f32.mrf.mxu1 }
 0x8e9   :  { %v1432_v17 = vpop.f32.mrf.mxu0 }
 0x8ea   :  { %5736 = vmatprep.mubr.msk.f32.mxu0 %vm362_vm2, %v1432_v17 }
 0x8eb   :  { %v5728_v21 = vpop.f32.mrf.mxu0  ;;  %5737 = vmatmul.mubr.msk.f32.vlgmr.msra.gmra.mxu0 %vm362_vm2, %v1508_v11 }
 0x8ec   :  { %5745 = vmatpush3.xpose.msk.msra.mxu0 %vm362_vm2, %v1676_v16  ;;  %5746 = vmatprep.mubr.msk.f32.mxu0 %vm6171_vm1, %v6170_v18 }
 0x8ed   :  { %5754 = vmatprep.subr.mxu0 %v6170_v18 }
 0x8ef   :  { %5747 = vmatmul.mubr.msk.f32.vlgmr.msra.gmra.mxu0 %vm362_vm2, %v1674_v22 }
 0x8f0   :  { %5756 = vmatprep.mubr.msk.f32.mxu0 %vm6171_vm1, %v6170_v18 }
 0x96d   :  { %v1753_v23 = vpop.xlane.xlu0 %1752 }
 0x96e   :  { %v1757_v26 = vsub.f32 %v1669_v13, %v1753_v23 }
 0x970   :  { %v1759_v27 = vmul.f32 1.442695, %v1757_v26 }
 0x972   :  { %6007 = vpow2.f32 %v1759_v27 }
 0x97f   :  { %v6008_v28 = vpop.eup %6007 }
 0x980   :  { %v1763_v30 = vsel %vm362_vm2, %v6008_v28, 0.0 }
 0x981   :  { %1764 = vadd.xlane.f32.xlu0 %v1763_v30 }
 0x9ab   :  { %v5738_v35 = vpop.f32.mrf.mxu0 }
 0x9ac   :  { %v6406_v37 = vadd.f32 %v5738_v35, %v1179_v33 }
 0x9ad   :  { %v1584_v38 = vpop.f32.mrf.mxu0 }
 0x9ae   :  { %v6408_v39 = vadd.f32 %v1584_v38, %v1174_v36 }
 0x9af   :  { %v1747_v40 = vpop.f32.mrf.mxu0 }
 0x9b0   :  { %v1754_v41 = vsel %vm362_vm2, %v1747_v40, -inf }
 0x9b1   :  { %1755 = vmax.xlane.f32.xlu1 %v1754_v41  ;;  %v5748_v42 = vpop.f32.mrf.mxu0 }
 0x9c2   :  { %1773 = vrot.lane.b32.xlu1 %v6251_v24, %s6182_s25 }
 0x9c6   :  { %2025 = vrot.lane.b32.xlu1 %v6417_v44, %s6172_s9 }
 0x9ca   :  { %2103 = vrot.lane.b32.xlu1 %v6422_v45, %s6172_s9 }
 0xa0a   :  { %v1765_v46 = vpop.xlane.xlu0 %1764 }
 0xa0b   :  { %6009 = vrcp.f32 %v1765_v46 }
 0xa18   :  { %v6010_v48 = vpop.eup %6009 }
 0xa19   :  { %v1771_v52 = vmul.f32 %v6010_v48, %v6008_v28 }
 0xa3a   :  { %v1756_v47 = vpop.xlane.xlu1 %1755 }
 0xa3b   :  { %v1758_v49 = vsub.f32 %v1747_v40, %v1756_v47 }
 0xa3d   :  { %v1761_v50 = vmul.f32 1.442695, %v1758_v49 }
 0xa3e   :  { %v1774_v51 = vpop.permute.xlu1 %1773 }
 0xa3f   :  { %6011 = vpow2.f32 %v1761_v50  ;;  %5750 = vmatpush3.msra.mxu1 %v1774_v51 }
 0xa40   :  { %5752 = vmatmul.mubr.msk.f32.vlgmr.msra.gmra.mxu1 %vm362_vm2, %v1771_v52  ;;  %5759 = vmatprep.subr.mxu1 %v358_v19 }
 0xa41   :  { %5760 = vmatpush3.msra.mxu1 %v358_v19 }
 0xa42   :  { %5769 = vmatprep.subr.mxu1 %v6170_v18  ;;  %v2026_v58 = vpop.permute.xlu1 %2025 }
 0xa46   :  { %v2104_v62 = vpop.permute.xlu1 %2103 }
 0xa4c   :  { %v6012_v20 = vpop.eup %6011 }
 0xa4d   :  { %v1766_v53 = vsel %vm362_vm2, %v6012_v20, 0.0 }
 0xa4e   :  { %1767 = vadd.xlane.f32.xlu0 %v1766_v53 }
 0xa64   :  { %1849 = vrot.lane.b32.xlu0 %v6255_v25, %s6182_s25 }
 0xad7   :  { %v1768_v54 = vpop.xlane.xlu0 %1767 }
 0xad8   :  { %6013 = vrcp.f32 %v1768_v54 }
 0xadb   :  { %v1850_v55 = vpop.permute.xlu0 %1849 }
 0xadc   :  { %5755 = vmatpush3.msra.mxu0 %v1850_v55 }
 0xadd   :  { %5764 = vmatprep.subr.mxu0 %v6170_v18 }
 0xae5   :  { %v6014_v56 = vpop.eup %6013 }
 0xae6   :  { %v1772_v57 = vmul.f32 %v6014_v56, %v6012_v20 }
 0xae8   :  { %5757 = vmatmul.mubr.msk.f32.vlgmr.msra.gmra.mxu0 %vm362_vm2, %v1772_v57 }
 0xae9   :  { %5765 = vmatpush3.xpose.msk.msra.mxu0 %vm362_vm2, %v2026_v58  ;;  %5766 = vmatprep.mubr.msk.f32.mxu0 %vm6171_vm1, %v6170_v18 }
 0xaea   :  { %5774 = vmatprep.subr.mxu0 %v6170_v18 }
 0xaec   :  { %5767 = vmatmul.mubr.msk.f32.vlgmr.msra.gmra.mxu0 %vm362_vm2, %v6437_v59 }
 0xaed   :  { %5776 = vmatprep.mubr.msk.f32.mxu0 %vm6171_vm1, %v6170_v18 }
 0xb00   :  { %v1845_v60 = vpop.f32.mrf.mxu1 }
 0xb01   :  { %5761 = vmatprep.mubr.msk.f32.mxu1 %vm362_vm2, %v1845_v60 }
 0xb02   :  { %v5753_v61 = vpop.f32.mrf.mxu1 }
 0xba8   :  { %v1921_v34 = vpop.f32.mrf.mxu0 }
 0xba9   :  { %5762 = vmatmul.mubr.msk.f32.vlgmr.msra.gmra.mxu1 %vm362_vm2, %v1921_v34 }
 0xbaa   :  { %5770 = vmatpush3.xpose.msk.msra.mxu1 %vm362_vm2, %v2104_v62  ;;  %v5758_v24 = vpop.f32.mrf.mxu0  ;;  %5771 = vmatprep.mubr.msk.f32.mxu1 %vm6171_vm1, %v6170_v18 }
 0xbab   :  { %5779 = vmatprep.subr.mxu1 %v6170_v18 }
 0xbac   :  { %v2098_v0 = vpop.f32.mrf.mxu0 }
 0xbad   :  { %5772 = vmatmul.mubr.msk.f32.vlgmr.msra.gmra.mxu1 %vm362_vm2, %v6450_v63  ;;  %v2180_v1 = vsel %vm362_vm2, %v2098_v0, -inf }
 0xbae   :  { %2181 = vmax.xlane.f32.xlu0 %v2180_v1  ;;  %v5768_v2 = vpop.f32.mrf.mxu0  ;;  %5781 = vmatprep.mubr.msk.f32.mxu1 %vm6171_vm1, %v6170_v18 }
 0xc37   :  { %v2182_v3 = vpop.xlane.xlu0 %2181 }
 0xc38   :  { %v2186_v4 = vsub.f32 %v2098_v0, %v2182_v3  ;;  %v2020_v3 = vld [vmem:[#allocation7 + $0x20] sm:$0xff] }
 0xc3a   :  { %v2188_v5 = vmul.f32 1.442695, %v2186_v4 }
 0xc3c   :  { %6015 = vpow2.f32 %v2188_v5 }
 0xc49   :  { %v6016_v6 = vpop.eup %6015 }
 0xc4a   :  { %v2192_v25 = vsel %vm362_vm2, %v6016_v6, 0.0 }
 0xc4b   :  { %2193 = vadd.xlane.f32.xlu0 %v2192_v25 }
 0xc61   :  { %2278 = vrot.lane.b32.xlu0 %v6422_v45, %s6173_s12 }
 0xc69   :  { %v5763_v7 = vpop.f32.mrf.mxu1 }
 0xc6a   :  { %v2007_v32 = vadd.f32 %v5763_v7, %v6406_v37 }
 0xc6b   :  { %v1997_v9 = vpop.f32.mrf.mxu1 }
 0xc6c   :  { %v2016_v10 = vadd.f32 %v5412_v8, %v2007_v32  ;;  %v2006_v11 = vadd.f32 %v1997_v9, %v6408_v39  ;;  %v2021_v32 = vld [vmem:[#allocation7 + $0x28] sm:$0xff] }
 0xc6d   :  { %v2176_v12 = vpop.f32.mrf.mxu1 }
 0xc6e   :  { %2018 = vst.msk [vmem:[#allocation8 + $0x18] sm:$0xff] %vm79_vm0, %v2016_v10  ;;  %v2015_v13 = vadd.f32 %v5412_v8, %v2006_v11  ;;  %v2183_v14 = vsel %vm362_vm2, %v2176_v12, -inf }
 0xc6f   :  { %2184 = vmax.xlane.f32.xlu1 %v2183_v14  ;;  %v5773_v15 = vpop.f32.mrf.mxu1 }
 0xc70   :  { %2017 = vst.msk [vmem:[#allocation8] sm:$0xff] %vm79_vm0, %v2015_v13 }
 0xc80   :  { %2202 = vrot.lane.b32.xlu1 %v6417_v44, %s6173_s12 }
 0xc84   :  { %2356 = vrot.lane.b32.xlu1 %v6417_v44, %s6174_s13 }
 0xc88   :  { %2434 = vrot.lane.b32.xlu1 %v6422_v45, %s6174_s13 }
 0xc8c   :  { %2432 = vrot.lane.b32.xlu1 %v6450_v63, %s6175_s14 }
 0xcd4   :  { %v2194_v16 = vpop.xlane.xlu0 %2193 }
 0xcd5   :  { %6017 = vrcp.f32 %v2194_v16 }
 0xcd8   :  { %v2279_v17 = vpop.permute.xlu0 %2278 }
 0xcd9   :  { %5780 = vmatpush3.msra.mxu1 %v2279_v17 }
 0xcda   :  { %5789 = vmatprep.subr.mxu1 %v6170_v18 }
 0xce2   :  { %v6018_v22 = vpop.eup %6017 }
 0xce3   :  { %v2200_v28 = vmul.f32 %v6018_v22, %v6016_v6 }
 0xcf8   :  { %v2185_v21 = vpop.xlane.xlu1 %2184 }
 0xcf9   :  { %v2187_v23 = vsub.f32 %v2176_v12, %v2185_v21 }
 0xcfb   :  { %v2190_v26 = vmul.f32 1.442695, %v2187_v23 }
 0xcfc   :  { %v2203_v27 = vpop.permute.xlu1 %2202 }
 0xcfd   :  { %6019 = vpow2.f32 %v2190_v26  ;;  %5775 = vmatpush3.msra.mxu0 %v2203_v27 }
 0xcfe   :  { %5777 = vmatmul.mubr.msk.f32.vlgmr.msra.gmra.mxu0 %vm362_vm2, %v2200_v28  ;;  %5784 = vmatprep.subr.mxu0 %v6170_v18 }
 0xcff   :  { %5786 = vmatprep.mubr.msk.f32.mxu0 %vm6171_vm1, %v6170_v18 }
 0xd00   :  { %v2357_v30 = vpop.permute.xlu1 %2356 }
 0xd01   :  { %5785 = vmatpush3.xpose.msk.msra.mxu0 %vm362_vm2, %v2357_v30 }
 0xd02   :  { %5794 = vmatprep.subr.mxu0 %v6170_v18 }
 0xd04   :  { %v2435_v39 = vpop.permute.xlu1 %2434 }
 0xd08   :  { %v2433_v41 = vpop.permute.xlu1 %2432 }
 0xd0a   :  { %v6020_v33 = vpop.eup %6019 }
 0xd0b   :  { %v2195_v35 = vsel %vm362_vm2, %v6020_v33, 0.0 }
 0xd0c   :  { %2196 = vadd.xlane.f32.xlu0 %v2195_v35 }
 0xd22   :  { %2354 = vrot.lane.b32.xlu0 %v6437_v59, %s6175_s14 }
 0xd95   :  { %v2197_v36 = vpop.xlane.xlu0 %2196 }
 0xd96   :  { %6021 = vrcp.f32 %v2197_v36 }
 0xd99   :  { %v2355_v37 = vpop.permute.xlu0 %2354 }
 0xd9a   :  { %5787 = vmatmul.mubr.msk.f32.vlgmr.msra.gmra.mxu0 %vm362_vm2, %v2355_v37 }
 0xd9b   :  { %5796 = vmatprep.mubr.msk.f32.mxu0 %vm6171_vm1, %v6170_v18 }
 0xda3   :  { %v6022_v38 = vpop.eup %6021 }
 0xda4   :  { %v2201_v40 = vmul.f32 %v6022_v38, %v6020_v33 }
 0xda6   :  { %5782 = vmatmul.mubr.msk.f32.vlgmr.msra.gmra.mxu1 %vm362_vm2, %v2201_v40 }
 0xda7   :  { %5790 = vmatpush3.xpose.msk.msra.mxu1 %vm362_vm2, %v2435_v39  ;;  %5791 = vmatprep.mubr.msk.f32.mxu1 %vm6171_vm1, %v6170_v18 }
 0xda8   :  { %5799 = vmatprep.subr.mxu1 %v6170_v18 }
 0xdaa   :  { %5792 = vmatmul.mubr.msk.f32.vlgmr.msra.gmra.mxu1 %vm362_vm2, %v2433_v41 }
 0xdab   :  { %5801 = vmatprep.mubr.msk.f32.mxu1 %vm6171_vm1, %v6170_v18 }
 0xdbe   :  { %v2274_v42 = vpop.f32.mrf.mxu0 }
 0xdc0   :  { %v5778_v43 = vpop.f32.mrf.mxu0 }
 0xe5a   :  { %v2428_v46 = vpop.f32.mrf.mxu0 }
 0xe5b   :  { %v2510_v47 = vsel %vm362_vm2, %v2428_v46, -inf }
 0xe5c   :  { %2511 = vmax.xlane.f32.xlu0 %v2510_v47  ;;  %v5788_v48 = vpop.f32.mrf.mxu0 }
 0xe66   :  { %v2350_v49 = vpop.f32.mrf.mxu1 }
 0xe68   :  { %v5783_v50 = vpop.f32.mrf.mxu1 }
 0xe6a   :  { %v2506_v51 = vpop.f32.mrf.mxu1 }
 0xe6b   :  { %v2513_v52 = vsel %vm362_vm2, %v2506_v51, -inf }
 0xe6c   :  { %2514 = vmax.xlane.f32.xlu1 %v2513_v52  ;;  %v5793_v20 = vpop.f32.mrf.mxu1 }
 0xe6d   :  { %v2022_v20 = vld [vmem:[#allocation7 + $0x30] sm:$0xff] }
 0xe7d   :  { %2532 = vrot.lane.b32.xlu1 %v6417_v44, %s6176_s15 }
 0xe81   :  { %2848 = vrot.lane.b32.xlu1 %v6417_v44, %s6178_s17 }
 0xe85   :  { %2926 = vrot.lane.b32.xlu1 %v6422_v45, %s6178_s17 }
 0xe89   :  { %2924 = vrot.lane.b32.xlu1 %v6450_v63, %s6177_s16 }
 0xee5   :  { %v2512_v53 = vpop.xlane.xlu0 %2511 }
 0xee6   :  { %v2516_v19 = vsub.f32 %v2428_v46, %v2512_v53 }
 0xee8   :  { %v2518_v54 = vmul.f32 1.442695, %v2516_v19 }
 0xeea   :  { %6023 = vpow2.f32 %v2518_v54 }
 0xef5   :  { %v2515_v55 = vpop.xlane.xlu1 %2514 }
 0xef6   :  { %v2517_v56 = vsub.f32 %v2506_v51, %v2515_v55 }
 0xef7   :  { %v6024_v57 = vpop.eup %6023 }
 0xef8   :  { %v2520_v58 = vmul.f32 1.442695, %v2517_v56  ;;  %v2522_v60 = vsel %vm362_vm2, %v6024_v57, 0.0 }
 0xef9   :  { %2523 = vadd.xlane.f32.xlu0 %v2522_v60  ;;  %v2533_v61 = vpop.permute.xlu1 %2532 }
 0xefa   :  { %6025 = vpow2.f32 %v2520_v58  ;;  %5795 = vmatpush3.msra.mxu0 %v2533_v61 }
 0xefb   :  { %5804 = vmatprep.subr.mxu0 %v2021_v32 }
 0xefd   :  { %v2849_v5 = vpop.permute.xlu1 %2848 }
 0xf01   :  { %v2927_v7 = vpop.permute.xlu1 %2926 }
 0xf05   :  { %v2925_v8 = vpop.permute.xlu1 %2924 }
 0xf07   :  { %v6026_v34 = vpop.eup %6025 }
 0xf08   :  { %v2525_v62 = vsel %vm362_vm2, %v6026_v34, 0.0 }
 0xf09   :  { %2526 = vadd.xlane.f32.xlu0 %v2525_v62 }
 0xf1f   :  { %2608 = vrot.lane.b32.xlu0 %v6422_v45, %s6176_s15 }
 0xf23   :  { %2846 = vrot.lane.b32.xlu0 %v6437_v59, %s6177_s16 }
 0xf82   :  { %v2524_v24 = vpop.xlane.xlu0 %2523 }
 0xf83   :  { %6027 = vrcp.f32 %v2524_v24 }
 0xf90   :  { %v6028_v0 = vpop.eup %6027 }
 0xf91   :  { %v2530_v1 = vmul.f32 %v6028_v0, %v6024_v57 }
 0xf92   :  { %v2527_v2 = vpop.xlane.xlu0 %2526 }
 0xf93   :  { %6029 = vrcp.f32 %v2527_v2  ;;  %5797 = vmatmul.mubr.msk.f32.vlgmr.msra.gmra.mxu0 %vm362_vm2, %v2530_v1 }
 0xf94   :  { %5805 = vmatpush3.msra.mxu0 %v2021_v32 }
 0xf95   :  { %5814 = vmatprep.subr.mxu0 %v6170_v18 }
 0xf96   :  { %v2609_v4 = vpop.permute.xlu0 %2608 }
 0xf97   :  { %5800 = vmatpush3.msra.mxu1 %v2609_v4 }
 0xf98   :  { %5809 = vmatprep.subr.mxu1 %v2020_v3 }
 0xf9a   :  { %v2847_v13 = vpop.permute.xlu0 %2846 }
 0xfa0   :  { %v6030_v6 = vpop.eup %6029 }
 0xfa1   :  { %v2531_v25 = vmul.f32 %v6030_v6, %v6026_v34 }
 0xfa3   :  { %5802 = vmatmul.mubr.msk.f32.vlgmr.msra.gmra.mxu1 %vm362_vm2, %v2531_v25 }
 0xfa4   :  { %5811 = vmatprep.mubr.msk.f32.mxu1 %vm362_vm2, %v2274_v42  ;;  %5810 = vmatpush3.msra.mxu1 %v2020_v3 }
 0xfa5   :  { %5819 = vmatprep.subr.mxu1 %v6170_v18 }
 0xfa7   :  { %5812 = vmatmul.mubr.msk.f32.vlgmr.msra.gmra.mxu1 %vm362_vm2, %v2350_v49 }
 0xfa8   :  { %5820 = vmatpush3.xpose.msk.msra.mxu1 %vm362_vm2, %v2927_v7  ;;  %5821 = vmatprep.mubr.msk.f32.mxu1 %vm6171_vm1, %v6170_v18 }
 0xfa9   :  { %5829 = vmatprep.subr.mxu1 %v6170_v18 }
 0xfab   :  { %5822 = vmatmul.mubr.msk.f32.vlgmr.msra.gmra.mxu1 %vm362_vm2, %v2925_v8 }
 0xfac   :  { %5831 = vmatprep.mubr.msk.f32.mxu1 %vm6171_vm1, %v6170_v18 }
0x1053   :  { %v2604_v9 = vpop.f32.mrf.mxu0 }
0x1054   :  { %5806 = vmatprep.mubr.msk.f32.mxu0 %vm362_vm2, %v2604_v9 }
0x1055   :  { %v5798_v10 = vpop.f32.mrf.mxu0 }
0x1063   :  { %v2680_v11 = vpop.f32.mrf.mxu1 }
0x1064   :  { %5807 = vmatmul.mubr.msk.f32.vlgmr.msra.gmra.mxu0 %vm362_vm2, %v2680_v11 }
0x1065   :  { %5815 = vmatpush3.xpose.msk.msra.mxu0 %vm362_vm2, %v2849_v5  ;;  %v5803_v12 = vpop.f32.mrf.mxu1  ;;  %5816 = vmatprep.mubr.msk.f32.mxu0 %vm6171_vm1, %v6170_v18 }
0x1066   :  { %5824 = vmatprep.subr.mxu0 %v6170_v18 }
0x1067   :  { %v6533_v14 = vpop.f32.mrf.mxu1 }
0x1068   :  { %5817 = vmatmul.mubr.msk.f32.vlgmr.msra.gmra.mxu0 %vm362_vm2, %v2847_v13 }
0x1069   :  { %v6536_v15 = vpop.f32.mrf.mxu1  ;;  %5826 = vmatprep.mubr.msk.f32.mxu0 %vm6171_vm1, %v6170_v18 }
0x106b   :  { %v2998_v16 = vpop.f32.mrf.mxu1 }
0x106c   :  { %v3005_v17 = vsel %vm362_vm2, %v2998_v16, -inf }
0x106d   :  { %3006 = vmax.xlane.f32.xlu1 %v3005_v17  ;;  %v5823_v21 = vpop.f32.mrf.mxu1 }
0x106e   :  { %v2023_v21 = vld [vmem:[#allocation7 + $0x38] sm:$0xff] }
0x107e   :  { %3024 = vrot.lane.b32.xlu1 %v6417_v44, %s6179_s18 }
0x1082   :  { %3261 = vrot.lane.b32.xlu1 %v6417_v44, %s6180_s19 }
0x1086   :  { %3339 = vrot.lane.b32.xlu1 %v6422_v45, %s6180_s19 }
0x108a   :  { %3337 = vrot.lane.b32.xlu1 %v6450_v63, %s6181_s20 }
0x10f6   :  { %v3007_v22 = vpop.xlane.xlu1 %3006 }
0x10f7   :  { %v3009_v26 = vsub.f32 %v2998_v16, %v3007_v22 }
0x10f9   :  { %v3012_v27 = vmul.f32 1.442695, %v3009_v26 }
0x10fa   :  { %v3025_v23 = vpop.permute.xlu1 %3024 }
0x10fb   :  { %5825 = vmatpush3.msra.mxu0 %v3025_v23  ;;  %6031 = vpow2.f32 %v3012_v27 }
0x10fc   :  { %5834 = vmatprep.subr.mxu0 %v2022_v20 }
0x10fe   :  { %v3262_v50 = vpop.permute.xlu1 %3261 }
0x1102   :  { %v3340_v57 = vpop.permute.xlu1 %3339 }
0x1106   :  { %v3338_v61 = vpop.permute.xlu1 %3337 }
0x1108   :  { %v6032_v36 = vpop.eup %6031 }
0x1109   :  { %v3017_v38 = vsel %vm362_vm2, %v6032_v36, 0.0 }
0x1124   :  { %v6549_v28 = vpop.f32.mrf.mxu0 }
0x1125   :  { %v2843_v2 = vadd.f32 %v6533_v14, %v6549_v28 }
0x1126   :  { %v6551_v30 = vpop.f32.mrf.mxu0 }
0x1127   :  { %v2838_v4 = vadd.f32 %v6536_v15, %v6551_v30  ;;  %v6608_v30 = vmul.f32 0.17677669, %v6417_v44 }
0x1128   :  { %v2920_v33 = vpop.f32.mrf.mxu0 }
0x1129   :  { %v3002_v35 = vsel %vm362_vm2, %v2920_v33, -inf }
0x112a   :  { %3003 = vmax.xlane.f32.xlu0 %v3002_v35  ;;  %v5818_v37 = vpop.f32.mrf.mxu0 }
0x112e   :  { %3018 = vadd.xlane.f32.xlu0 %v3017_v38  ;;  %v6621_v38 = vmul.f32 0.17677669, %v6422_v45 }
0x11b3   :  { %v3004_v63 = vpop.xlane.xlu0 %3003 }
0x11b4   :  { %v3008_v39 = vsub.f32 %v2920_v33, %v3004_v63 }
0x11b6   :  { %v3010_v40 = vmul.f32 1.442695, %v3008_v39 }
0x11b7   :  { %v3019_v43 = vpop.xlane.xlu0 %3018 }
0x11b8   :  { %6033 = vpow2.f32 %v3010_v40 }
0x11b9   :  { %6035 = vrcp.f32 %v3019_v43 }
0x11c5   :  { %v6034_v41 = vpop.eup %6033 }
0x11c6   :  { %v3014_v42 = vsel %vm362_vm2, %v6034_v41, 0.0  ;;  %v6036_v47 = vpop.eup %6035 }
0x11c7   :  { %3015 = vadd.xlane.f32.xlu0 %v3014_v42  ;;  %v3023_v49 = vmul.f32 %v6036_v47, %v6032_v36 }
0x11dd   :  { %3100 = vrot.lane.b32.xlu0 %v6422_v45, %s6179_s18 }
0x11e1   :  { %3259 = vrot.lane.b32.xlu0 %v6437_v59, %s6181_s20 }
0x1250   :  { %v3016_v46 = vpop.xlane.xlu0 %3015 }
0x1251   :  { %6037 = vrcp.f32 %v3016_v46 }
0x1254   :  { %v3101_v48 = vpop.permute.xlu0 %3100 }
0x1255   :  { %5830 = vmatpush3.msra.mxu1 %v3101_v48  ;;  %v5446_v48 = vld [vmem:[%s6782_s4 + $0x1] ss:$0 sm:$0xff] }
0x1256   :  { %5832 = vmatmul.mubr.msk.f32.vlgmr.msra.gmra.mxu1 %vm362_vm2, %v3023_v49  ;;  %5839 = vmatprep.subr.mxu1 %v6170_v18 }
0x1257   :  { %5840 = vmatpush3.xpose.msk.msra.mxu1 %vm362_vm2, %v3262_v50  ;;  %5841 = vmatprep.mubr.msk.f32.mxu1 %vm6171_vm1, %v6170_v18 }
0x1258   :  { %v3260_v51 = vpop.permute.xlu0 %3259  ;;  %5849 = vmatprep.subr.mxu1 %v6170_v18 }
0x125a   :  { %5842 = vmatmul.mubr.msk.f32.vlgmr.msra.gmra.mxu1 %vm362_vm2, %v3260_v51 }
0x125b   :  { %5851 = vmatprep.mubr.msk.f32.mxu1 %vm6171_vm1, %v6170_v18 }
0x125e   :  { %v6038_v59 = vpop.eup %6037 }
0x125f   :  { %v3022_v52 = vmul.f32 %v6038_v59, %v6034_v41 }
0x1261   :  { %5827 = vmatmul.mubr.msk.f32.vlgmr.msra.gmra.mxu0 %vm362_vm2, %v3022_v52 }
0x1262   :  { %5835 = vmatpush3.msra.mxu0 %v2022_v20 }
0x1263   :  { %5844 = vmatprep.subr.mxu0 %v6170_v18 }
0x1316   :  { %v3172_v53 = vpop.f32.mrf.mxu1 }
0x1318   :  { %v5833_v19 = vpop.f32.mrf.mxu1 }
0x131a   :  { %v3333_v54 = vpop.f32.mrf.mxu1 }
0x131b   :  { %v3415_v55 = vsel %vm362_vm2, %v3333_v54, -inf }
0x131c   :  { %3416 = vmax.xlane.f32.xlu0 %v3415_v55  ;;  %v5843_v56 = vpop.f32.mrf.mxu1 }
0x1321   :  { %v3096_v58 = vpop.f32.mrf.mxu0 }
0x1322   :  { %5836 = vmatprep.mubr.msk.f32.mxu0 %vm362_vm2, %v3096_v58 }
0x1323   :  { %v5828_v60 = vpop.f32.mrf.mxu0  ;;  %5837 = vmatmul.mubr.msk.f32.vlgmr.msra.gmra.mxu0 %vm362_vm2, %v3172_v53 }
0x1324   :  { %5845 = vmatpush3.xpose.msk.msra.mxu0 %vm362_vm2, %v3340_v57  ;;  %5846 = vmatprep.mubr.msk.f32.mxu0 %vm6171_vm1, %v6170_v18 }
0x1325   :  { %5854 = vmatprep.subr.mxu0 %v6170_v18 }
0x1327   :  { %5847 = vmatmul.mubr.msk.f32.vlgmr.msra.gmra.mxu0 %vm362_vm2, %v3338_v61 }
0x1328   :  { %5856 = vmatprep.mubr.msk.f32.mxu0 %vm6171_vm1, %v6170_v18 }
0x13a5   :  { %v3417_v34 = vpop.xlane.xlu0 %3416 }
0x13a6   :  { %v3421_v62 = vsub.f32 %v3333_v54, %v3417_v34 }
0x13a8   :  { %v3423_v24 = vmul.f32 1.442695, %v3421_v62 }
0x13aa   :  { %6039 = vpow2.f32 %v3423_v24 }
0x13b7   :  { %v6040_v0 = vpop.eup %6039 }
0x13b8   :  { %v3427_v1 = vsel %vm362_vm2, %v6040_v0, 0.0 }
0x13b9   :  { %3428 = vadd.xlane.f32.xlu0 %v3427_v1 }
0x13e3   :  { %v5838_v3 = vpop.f32.mrf.mxu0 }
0x13e4   :  { %v6586_v5 = vadd.f32 %v5838_v3, %v2843_v2 }
0x13e5   :  { %v3248_v6 = vpop.f32.mrf.mxu0 }
0x13e6   :  { %v6588_v25 = vadd.f32 %v3248_v6, %v2838_v4 }
0x13e7   :  { %v3411_v7 = vpop.f32.mrf.mxu0 }
0x13e8   :  { %v3418_v8 = vsel %vm362_vm2, %v3411_v7, -inf }
0x13e9   :  { %3419 = vmax.xlane.f32.xlu1 %v3418_v8  ;;  %v5848_v32 = vpop.f32.mrf.mxu0 }
0x13fa   :  { %3437 = vrot.lane.b32.xlu1 %v6417_v44, %s6182_s25 }
0x13fe   :  { %3691 = vrot.lane.b32.xlu1 %v6262_v29, %s6172_s9 }
0x1402   :  { %3769 = vrot.lane.b32.xlu1 %v6265_v31, %s6172_s9 }
0x1442   :  { %v3429_v9 = vpop.xlane.xlu0 %3428 }
0x1443   :  { %6041 = vrcp.f32 %v3429_v9 }
0x1450   :  { %v6042_v11 = vpop.eup %6041 }
0x1451   :  { %v3435_v15 = vmul.f32 %v6042_v11, %v6040_v0 }
0x1472   :  { %v3420_v10 = vpop.xlane.xlu1 %3419 }
0x1473   :  { %v3422_v12 = vsub.f32 %v3411_v7, %v3420_v10 }
0x1475   :  { %v3425_v13 = vmul.f32 1.442695, %v3422_v12 }
0x1476   :  { %v3438_v14 = vpop.permute.xlu1 %3437 }
0x1477   :  { %6043 = vpow2.f32 %v3425_v13  ;;  %5850 = vmatpush3.msra.mxu1 %v3438_v14 }
0x1478   :  { %5852 = vmatmul.mubr.msk.f32.vlgmr.msra.gmra.mxu1 %vm362_vm2, %v3435_v15  ;;  %5859 = vmatprep.subr.mxu1 %v2023_v21 }
0x1479   :  { %5860 = vmatpush3.msra.mxu1 %v2023_v21 }
0x147a   :  { %5869 = vmatprep.subr.mxu1 %v6170_v18  ;;  %v3692_v28 = vpop.permute.xlu1 %3691 }
0x147e   :  { %v3770_v37 = vpop.permute.xlu1 %3769 }
0x1484   :  { %v6044_v16 = vpop.eup %6043 }
0x1485   :  { %v3430_v17 = vsel %vm362_vm2, %v6044_v16, 0.0 }
0x1486   :  { %3431 = vadd.xlane.f32.xlu0 %v3430_v17 }
0x149c   :  { %3513 = vrot.lane.b32.xlu0 %v6422_v45, %s6182_s25 }
0x150f   :  { %v3432_v22 = vpop.xlane.xlu0 %3431 }
0x1510   :  { %6045 = vrcp.f32 %v3432_v22 }
0x1513   :  { %v3514_v23 = vpop.permute.xlu0 %3513 }
0x1514   :  { %5855 = vmatpush3.msra.mxu0 %v3514_v23 }
0x1515   :  { %5864 = vmatprep.subr.mxu0 %v6170_v18 }
0x151d   :  { %v6046_v26 = vpop.eup %6045 }
0x151e   :  { %v3436_v27 = vmul.f32 %v6046_v26, %v6044_v16 }
0x1520   :  { %5857 = vmatmul.mubr.msk.f32.vlgmr.msra.gmra.mxu0 %vm362_vm2, %v3436_v27 }
0x1521   :  { %5865 = vmatpush3.xpose.msk.msra.mxu0 %vm362_vm2, %v3692_v28  ;;  %5866 = vmatprep.mubr.msk.f32.mxu0 %vm6171_vm1, %v6170_v18 }
0x1522   :  { %5874 = vmatprep.subr.mxu0 %v6170_v18 }
0x1524   :  { %5867 = vmatmul.mubr.msk.f32.vlgmr.msra.gmra.mxu0 %vm362_vm2, %v6608_v30 }
0x1525   :  { %5876 = vmatprep.mubr.msk.f32.mxu0 %vm6171_vm1, %v6170_v18 }
0x1538   :  { %v3509_v33 = vpop.f32.mrf.mxu1 }
0x1539   :  { %5861 = vmatprep.mubr.msk.f32.mxu1 %vm362_vm2, %v3509_v33 }
0x153a   :  { %v5853_v35 = vpop.f32.mrf.mxu1 }
0x15e0   :  { %v3585_v36 = vpop.f32.mrf.mxu0 }
0x15e1   :  { %5862 = vmatmul.mubr.msk.f32.vlgmr.msra.gmra.mxu1 %vm362_vm2, %v3585_v36 }
0x15e2   :  { %5870 = vmatpush3.xpose.msk.msra.mxu1 %vm362_vm2, %v3770_v37  ;;  %v5858_v44 = vpop.f32.mrf.mxu0  ;;  %5871 = vmatprep.mubr.msk.f32.mxu1 %vm6171_vm1, %v6170_v18 }
0x15e3   :  { %5879 = vmatprep.subr.mxu1 %v6170_v18 }
0x15e4   :  { %v3764_v63 = vpop.f32.mrf.mxu0 }
0x15e5   :  { %5872 = vmatmul.mubr.msk.f32.vlgmr.msra.gmra.mxu1 %vm362_vm2, %v6621_v38  ;;  %v3846_v39 = vsel %vm362_vm2, %v3764_v63, -inf }
0x15e6   :  { %3847 = vmax.xlane.f32.xlu0 %v3846_v39  ;;  %v5868_v40 = vpop.f32.mrf.mxu0  ;;  %5881 = vmatprep.mubr.msk.f32.mxu1 %vm6171_vm1, %v6170_v18  ;;  %v3686_v39 = vld [vmem:[#allocation7 + $0x40] sm:$0xff] }
0x166f   :  { %v3848_v41 = vpop.xlane.xlu0 %3847 }
0x1670   :  { %v3852_v42 = vsub.f32 %v3764_v63, %v3848_v41 }
0x1672   :  { %v3854_v43 = vmul.f32 1.442695, %v3852_v42 }
0x1674   :  { %6047 = vpow2.f32 %v3854_v43 }
0x1681   :  { %v6048_v46 = vpop.eup %6047 }
0x1682   :  { %v3858_v45 = vsel %vm362_vm2, %v6048_v46, 0.0 }
0x1683   :  { %3859 = vadd.xlane.f32.xlu0 %v3858_v45 }
0x1699   :  { %3944 = vrot.lane.b32.xlu0 %v6265_v31, %s6173_s12 }
0x16a1   :  { %v5863_v47 = vpop.f32.mrf.mxu1 }
0x16a2   :  { %v3671_v49 = vadd.f32 %v5863_v47, %v6586_v5  ;;  %v3687_v47 = vld [vmem:[#allocation7 + $0x48] sm:$0xff] }
0x16a3   :  { %v3661_v50 = vpop.f32.mrf.mxu1 }
0x16a4   :  { %v3681_v51 = vadd.f32 %v5446_v48, %v3671_v49  ;;  %v3670_v59 = vadd.f32 %v3661_v50, %v6588_v25 }
0x16a5   :  { %v3842_v52 = vpop.f32.mrf.mxu1 }
0x16a6   :  { %3684 = vst.msk [vmem:[#allocation8 + $0x20] sm:$0xff] %vm79_vm0, %v3681_v51  ;;  %v3680_v20 = vadd.f32 %v5446_v48, %v3670_v59  ;;  %v3849_v53 = vsel %vm362_vm2, %v3842_v52, -inf }
0x16a7   :  { %3850 = vmax.xlane.f32.xlu1 %v3849_v53  ;;  %v5873_v19 = vpop.f32.mrf.mxu1 }
0x16a8   :  { %3683 = vst.msk [vmem:[#allocation8 + $0x8] sm:$0xff] %vm79_vm0, %v3680_v20 }
0x16b8   :  { %3868 = vrot.lane.b32.xlu1 %v6262_v29, %s6173_s12 }
0x16bc   :  { %4022 = vrot.lane.b32.xlu1 %v6262_v29, %s6174_s13 }
0x16c0   :  { %4100 = vrot.lane.b32.xlu1 %v6265_v31, %s6174_s13 }
0x16c4   :  { %4098 = vrot.lane.b32.xlu1 %v6621_v38, %s6175_s14 }
0x170c   :  { %v3860_v54 = vpop.xlane.xlu0 %3859 }
0x170d   :  { %6049 = vrcp.f32 %v3860_v54 }
0x1710   :  { %v3945_v55 = vpop.permute.xlu0 %3944 }
0x1711   :  { %5880 = vmatpush3.msra.mxu1 %v3945_v55 }
0x1712   :  { %5889 = vmatprep.subr.mxu1 %v6170_v18 }
0x171a   :  { %v6050_v57 = vpop.eup %6049 }
0x171b   :  { %v3866_v34 = vmul.f32 %v6050_v57, %v6048_v46 }
0x1730   :  { %v3851_v56 = vpop.xlane.xlu1 %3850 }
0x1731   :  { %v3853_v58 = vsub.f32 %v3842_v52, %v3851_v56 }
0x1733   :  { %v3856_v60 = vmul.f32 1.442695, %v3853_v58 }
0x1734   :  { %v3869_v61 = vpop.permute.xlu1 %3868 }
0x1735   :  { %6051 = vpow2.f32 %v3856_v60  ;;  %5875 = vmatpush3.msra.mxu0 %v3869_v61 }
0x1736   :  { %5877 = vmatmul.mubr.msk.f32.vlgmr.msra.gmra.mxu0 %vm362_vm2, %v3866_v34  ;;  %5884 = vmatprep.subr.mxu0 %v6170_v18 }
0x1737   :  { %5886 = vmatprep.mubr.msk.f32.mxu0 %vm6171_vm1, %v6170_v18 }
0x1738   :  { %v4023_v62 = vpop.permute.xlu1 %4022 }
0x1739   :  { %5885 = vmatpush3.xpose.msk.msra.mxu0 %vm362_vm2, %v4023_v62 }
0x173a   :  { %5894 = vmatprep.subr.mxu0 %v6170_v18 }
0x173c   :  { %v4101_v4 = vpop.permute.xlu1 %4100 }
0x1740   :  { %v4099_v6 = vpop.permute.xlu1 %4098 }
0x1742   :  { %v6052_v24 = vpop.eup %6051 }
0x1743   :  { %v3861_v0 = vsel %vm362_vm2, %v6052_v24, 0.0 }
0x1744   :  { %3862 = vadd.xlane.f32.xlu0 %v3861_v0 }
0x175a   :  { %4020 = vrot.lane.b32.xlu0 %v6608_v30, %s6175_s14 }
0x17cd   :  { %v3863_v1 = vpop.xlane.xlu0 %3862 }
0x17ce   :  { %6053 = vrcp.f32 %v3863_v1 }
0x17d1   :  { %v4021_v2 = vpop.permute.xlu0 %4020 }
0x17d2   :  { %5887 = vmatmul.mubr.msk.f32.vlgmr.msra.gmra.mxu0 %vm362_vm2, %v4021_v2 }
0x17d3   :  { %5896 = vmatprep.mubr.msk.f32.mxu0 %vm6171_vm1, %v6170_v18 }
0x17db   :  { %v6054_v3 = vpop.eup %6053 }
0x17dc   :  { %v3867_v5 = vmul.f32 %v6054_v3, %v6052_v24 }
0x17de   :  { %5882 = vmatmul.mubr.msk.f32.vlgmr.msra.gmra.mxu1 %vm362_vm2, %v3867_v5 }
0x17df   :  { %5890 = vmatpush3.xpose.msk.msra.mxu1 %vm362_vm2, %v4101_v4  ;;  %5891 = vmatprep.mubr.msk.f32.mxu1 %vm6171_vm1, %v6170_v18 }
0x17e0   :  { %5899 = vmatprep.subr.mxu1 %v6170_v18 }
0x17e2   :  { %5892 = vmatmul.mubr.msk.f32.vlgmr.msra.gmra.mxu1 %vm362_vm2, %v4099_v6 }
0x17e3   :  { %5901 = vmatprep.mubr.msk.f32.mxu1 %vm6171_vm1, %v6170_v18 }
0x17f6   :  { %v3940_v25 = vpop.f32.mrf.mxu0 }
0x17f8   :  { %v5878_v7 = vpop.f32.mrf.mxu0 }
0x1892   :  { %v4094_v8 = vpop.f32.mrf.mxu0 }
0x1893   :  { %v4176_v32 = vsel %vm362_vm2, %v4094_v8, -inf }
0x1894   :  { %4177 = vmax.xlane.f32.xlu0 %v4176_v32  ;;  %v5888_v9 = vpop.f32.mrf.mxu0 }
0x189e   :  { %v4016_v10 = vpop.f32.mrf.mxu1 }
0x18a0   :  { %v5883_v11 = vpop.f32.mrf.mxu1 }
0x18a2   :  { %v4172_v12 = vpop.f32.mrf.mxu1 }
0x18a3   :  { %v4179_v13 = vsel %vm362_vm2, %v4172_v12, -inf }
0x18a4   :  { %4180 = vmax.xlane.f32.xlu1 %v4179_v13  ;;  %v5893_v14 = vpop.f32.mrf.mxu1 }
0x18b5   :  { %4198 = vrot.lane.b32.xlu1 %v6262_v29, %s6176_s15 }
0x18b9   :  { %4514 = vrot.lane.b32.xlu1 %v6262_v29, %s6178_s17 }
0x18bd   :  { %4592 = vrot.lane.b32.xlu1 %v6265_v31, %s6178_s17 }
0x18c1   :  { %4590 = vrot.lane.b32.xlu1 %v6621_v38, %s6177_s16 }
0x191d   :  { %v4178_v15 = vpop.xlane.xlu0 %4177 }
0x191e   :  { %v4182_v16 = vsub.f32 %v4094_v8, %v4178_v15 }
0x1920   :  { %v4184_v17 = vmul.f32 1.442695, %v4182_v16 }
0x1922   :  { %6055 = vpow2.f32 %v4184_v17 }
0x192d   :  { %v4181_v21 = vpop.xlane.xlu1 %4180 }
0x192e   :  { %v4183_v22 = vsub.f32 %v4172_v12, %v4181_v21  ;;  %v3688_v12 = vld [vmem:[#allocation7 + $0x50] sm:$0xff] }
0x192f   :  { %v6056_v23 = vpop.eup %6055 }
0x1930   :  { %v4186_v26 = vmul.f32 1.442695, %v4183_v22  ;;  %v4188_v27 = vsel %vm362_vm2, %v6056_v23, 0.0 }
0x1931   :  { %v4199_v28 = vpop.permute.xlu1 %4198  ;;  %4189 = vadd.xlane.f32.xlu0 %v4188_v27 }
0x1932   :  { %6057 = vpow2.f32 %v4186_v26  ;;  %5895 = vmatpush3.msra.mxu0 %v4199_v28 }
0x1933   :  { %5904 = vmatprep.subr.mxu0 %v3687_v47 }
0x1935   :  { %v4515_v41 = vpop.permute.xlu1 %4514 }
0x1939   :  { %v4593_v46 = vpop.permute.xlu1 %4592 }
0x193d   :  { %v4591_v45 = vpop.permute.xlu1 %4590 }
0x193f   :  { %v6058_v33 = vpop.eup %6057 }
0x1940   :  { %v4191_v35 = vsel %vm362_vm2, %v6058_v33, 0.0 }
0x1941   :  { %4192 = vadd.xlane.f32.xlu0 %v4191_v35 }
0x1957   :  { %4274 = vrot.lane.b32.xlu0 %v6265_v31, %s6176_s15 }
0x195b   :  { %4512 = vrot.lane.b32.xlu0 %v6608_v30, %s6177_s16 }
0x19ba   :  { %v4190_v36 = vpop.xlane.xlu0 %4189 }
0x19bb   :  { %6059 = vrcp.f32 %v4190_v36 }
0x19c8   :  { %v6060_v37 = vpop.eup %6059 }
0x19c9   :  { %v4196_v44 = vmul.f32 %v6060_v37, %v6056_v23 }
0x19ca   :  { %v4193_v63 = vpop.xlane.xlu0 %4192 }
0x19cb   :  { %6061 = vrcp.f32 %v4193_v63  ;;  %5897 = vmatmul.mubr.msk.f32.vlgmr.msra.gmra.mxu0 %vm362_vm2, %v4196_v44 }
0x19cc   :  { %5905 = vmatpush3.msra.mxu0 %v3687_v47 }
0x19cd   :  { %5914 = vmatprep.subr.mxu0 %v6170_v18 }
0x19ce   :  { %v4275_v40 = vpop.permute.xlu0 %4274 }
0x19cf   :  { %5900 = vmatpush3.msra.mxu1 %v4275_v40 }
0x19d0   :  { %5909 = vmatprep.subr.mxu1 %v3686_v39 }
0x19d2   :  { %v4513_v59 = vpop.permute.xlu0 %4512 }
0x19d8   :  { %v6062_v42 = vpop.eup %6061 }
0x19d9   :  { %v4197_v43 = vmul.f32 %v6062_v42, %v6058_v33 }
0x19db   :  { %5902 = vmatmul.mubr.msk.f32.vlgmr.msra.gmra.mxu1 %vm362_vm2, %v4197_v43 }
0x19dc   :  { %5911 = vmatprep.mubr.msk.f32.mxu1 %vm362_vm2, %v3940_v25  ;;  %5910 = vmatpush3.msra.mxu1 %v3686_v39 }
0x19dd   :  { %5919 = vmatprep.subr.mxu1 %v6170_v18 }
0x19df   :  { %5912 = vmatmul.mubr.msk.f32.vlgmr.msra.gmra.mxu1 %vm362_vm2, %v4016_v10 }
0x19e0   :  { %5920 = vmatpush3.xpose.msk.msra.mxu1 %vm362_vm2, %v4593_v46  ;;  %5921 = vmatprep.mubr.msk.f32.mxu1 %vm6171_vm1, %v6170_v18 }
0x19e1   :  { %5929 = vmatprep.subr.mxu1 %v6170_v18 }
0x19e3   :  { %5922 = vmatmul.mubr.msk.f32.vlgmr.msra.gmra.mxu1 %vm362_vm2, %v4591_v45 }
0x19e4   :  { %5931 = vmatprep.mubr.msk.f32.mxu1 %vm6171_vm1, %v6170_v18 }
0x1a8b   :  { %v4270_v48 = vpop.f32.mrf.mxu0 }
0x1a8c   :  { %5906 = vmatprep.mubr.msk.f32.mxu0 %vm362_vm2, %v4270_v48 }
0x1a8d   :  { %v5898_v49 = vpop.f32.mrf.mxu0 }
0x1a9b   :  { %v4346_v50 = vpop.f32.mrf.mxu1 }
0x1a9c   :  { %5907 = vmatmul.mubr.msk.f32.vlgmr.msra.gmra.mxu0 %vm362_vm2, %v4346_v50 }
0x1a9d   :  { %5915 = vmatpush3.xpose.msk.msra.mxu0 %vm362_vm2, %v4515_v41  ;;  %v5903_v51 = vpop.f32.mrf.mxu1  ;;  %5916 = vmatprep.mubr.msk.f32.mxu0 %vm6171_vm1, %v6170_v18 }
0x1a9e   :  { %5924 = vmatprep.subr.mxu0 %v6170_v18 }
0x1a9f   :  { %v6704_v52 = vpop.f32.mrf.mxu1 }
0x1aa0   :  { %5917 = vmatmul.mubr.msk.f32.vlgmr.msra.gmra.mxu0 %vm362_vm2, %v4513_v59 }
0x1aa1   :  { %v6707_v20 = vpop.f32.mrf.mxu1  ;;  %5926 = vmatprep.mubr.msk.f32.mxu0 %vm6171_vm1, %v6170_v18 }
0x1aa3   :  { %v4664_v53 = vpop.f32.mrf.mxu1 }
0x1aa4   :  { %v4671_v19 = vsel %vm362_vm2, %v4664_v53, -inf }
0x1aa5   :  { %4672 = vmax.xlane.f32.xlu1 %v4671_v19  ;;  %v5923_v54 = vpop.f32.mrf.mxu1 }
0x1ab6   :  { %4690 = vrot.lane.b32.xlu1 %v6262_v29, %s6179_s18 }
0x1aba   :  { %4927 = vrot.lane.b32.xlu1 %v6262_v29, %s6180_s19 }
0x1abe   :  { %5005 = vrot.lane.b32.xlu1 %v6265_v31, %s6180_s19 }
0x1ac2   :  { %5003 = vrot.lane.b32.xlu1 %v6621_v38, %s6181_s20 }
0x1b2e   :  { %v4673_v55 = vpop.xlane.xlu1 %4672 }
0x1b2f   :  { %v4675_v57 = vsub.f32 %v4664_v53, %v4673_v55 }
0x1b31   :  { %v4678_v58 = vmul.f32 1.442695, %v4675_v57 }
0x1b32   :  { %v4691_v56 = vpop.permute.xlu1 %4690 }
0x1b33   :  { %5925 = vmatpush3.msra.mxu0 %v4691_v56  ;;  %6063 = vpow2.f32 %v4678_v58 }
0x1b34   :  { %5934 = vmatprep.subr.mxu0 %v3688_v12 }
0x1b36   :  { %v4928_v9 = vpop.permute.xlu1 %4927 }
0x1b3a   :  { %v5006_v21 = vpop.permute.xlu1 %5005 }
0x1b3e   :  { %v5004_v26 = vpop.permute.xlu1 %5003 }
0x1b40   :  { %v6064_v24 = vpop.eup %6063 }
0x1b41   :  { %v4683_v1 = vsel %vm362_vm2, %v6064_v24, 0.0 }
0x1b5c   :  { %v6720_v60 = vpop.f32.mrf.mxu0 }
0x1b5d   :  { %v4509_v37 = vadd.f32 %v6704_v52, %v6720_v60  ;;  %v5480_v60 = vld [vmem:[%s6782_s4 + $0x2] ss:$0 sm:$0xff] }
0x1b5e   :  { %v6722_v61 = vpop.f32.mrf.mxu0 }
0x1b5f   :  { %v4504_v63 = vadd.f32 %v6707_v20, %v6722_v61 }
0x1b60   :  { %v4586_v34 = vpop.f32.mrf.mxu0 }
0x1b61   :  { %v4668_v62 = vsel %vm362_vm2, %v4586_v34, -inf }
0x1b62   :  { %4669 = vmax.xlane.f32.xlu0 %v4668_v62  ;;  %v5918_v0 = vpop.f32.mrf.mxu0 }
0x1b66   :  { %4684 = vadd.xlane.f32.xlu0 %v4683_v1 }
0x1beb   :  { %v4670_v38 = vpop.xlane.xlu0 %4669 }
0x1bec   :  { %v4674_v2 = vsub.f32 %v4586_v34, %v4670_v38 }
0x1bee   :  { %v4676_v3 = vmul.f32 1.442695, %v4674_v2 }
0x1bef   :  { %v4685_v6 = vpop.xlane.xlu0 %4684 }
0x1bf0   :  { %6065 = vpow2.f32 %v4676_v3 }
0x1bf1   :  { %6067 = vrcp.f32 %v4685_v6 }
0x1bfd   :  { %v6066_v4 = vpop.eup %6065 }
0x1bfe   :  { %v4680_v5 = vsel %vm362_vm2, %v6066_v4, 0.0  ;;  %v6068_v7 = vpop.eup %6067 }
0x1bff   :  { %4681 = vadd.xlane.f32.xlu0 %v4680_v5  ;;  %v4689_v32 = vmul.f32 %v6068_v7, %v6064_v24 }
0x1c15   :  { %4766 = vrot.lane.b32.xlu0 %v6265_v31, %s6179_s18 }
0x1c19   :  { %4925 = vrot.lane.b32.xlu0 %v6608_v30, %s6181_s20 }
0x1c88   :  { %v4682_v25 = vpop.xlane.xlu0 %4681 }
0x1c89   :  { %6069 = vrcp.f32 %v4682_v25 }
0x1c8c   :  { %v4767_v8 = vpop.permute.xlu0 %4766 }
0x1c8d   :  { %5930 = vmatpush3.msra.mxu1 %v4767_v8 }
0x1c8e   :  { %5932 = vmatmul.mubr.msk.f32.vlgmr.msra.gmra.mxu1 %vm362_vm2, %v4689_v32  ;;  %5939 = vmatprep.subr.mxu1 %v6170_v18 }
0x1c8f   :  { %5940 = vmatpush3.xpose.msk.msra.mxu1 %vm362_vm2, %v4928_v9  ;;  %5941 = vmatprep.mubr.msk.f32.mxu1 %vm6171_vm1, %v6170_v18 }
0x1c90   :  { %v4926_v10 = vpop.permute.xlu0 %4925  ;;  %5949 = vmatprep.subr.mxu1 %v6170_v18 }
0x1c92   :  { %5942 = vmatmul.mubr.msk.f32.vlgmr.msra.gmra.mxu1 %vm362_vm2, %v4926_v10 }
0x1c93   :  { %5951 = vmatprep.mubr.msk.f32.mxu1 %vm6171_vm1, %v6170_v18 }
0x1c96   :  { %v6070_v30 = vpop.eup %6069 }
0x1c97   :  { %v4688_v11 = vmul.f32 %v6070_v30, %v6066_v4 }
0x1c99   :  { %5927 = vmatmul.mubr.msk.f32.vlgmr.msra.gmra.mxu0 %vm362_vm2, %v4688_v11 }
0x1c9a   :  { %5935 = vmatpush3.msra.mxu0 %v3688_v12 }
0x1c9b   :  { %5944 = vmatprep.subr.mxu0 %v6170_v18 }
0x1d4e   :  { %v4838_v13 = vpop.f32.mrf.mxu1 }
0x1d50   :  { %v5933_v14 = vpop.f32.mrf.mxu1 }
0x1d52   :  { %v4999_v15 = vpop.f32.mrf.mxu1 }
0x1d53   :  { %v5081_v16 = vsel %vm362_vm2, %v4999_v15, -inf }
0x1d54   :  { %5082 = vmax.xlane.f32.xlu0 %v5081_v16  ;;  %v5943_v17 = vpop.f32.mrf.mxu1 }
0x1d59   :  { %v4762_v22 = vpop.f32.mrf.mxu0 }
0x1d5a   :  { %5936 = vmatprep.mubr.msk.f32.mxu0 %vm362_vm2, %v4762_v22 }
0x1d5b   :  { %v5928_v23 = vpop.f32.mrf.mxu0  ;;  %5937 = vmatmul.mubr.msk.f32.vlgmr.msra.gmra.mxu0 %vm362_vm2, %v4838_v13 }
0x1d5c   :  { %5945 = vmatpush3.xpose.msk.msra.mxu0 %vm362_vm2, %v5006_v21  ;;  %5946 = vmatprep.mubr.msk.f32.mxu0 %vm6171_vm1, %v6170_v18 }
0x1d5d   :  { %5954 = vmatprep.subr.mxu0 %v6170_v18 }
0x1d5f   :  { %5947 = vmatmul.mubr.msk.f32.vlgmr.msra.gmra.mxu0 %vm362_vm2, %v5004_v26 }
0x1d60   :  { %5956 = vmatprep.mubr.msk.f32.mxu0 %vm6171_vm1, %v6170_v18 }
0x1ddd   :  { %v5083_v27 = vpop.xlane.xlu0 %5082 }
0x1dde   :  { %v5087_v28 = vsub.f32 %v4999_v15, %v5083_v27 }
0x1de0   :  { %v5089_v33 = vmul.f32 1.442695, %v5087_v28 }
0x1de2   :  { %6071 = vpow2.f32 %v5089_v33 }
0x1def   :  { %v6072_v35 = vpop.eup %6071 }
0x1df0   :  { %v5093_v36 = vsel %vm362_vm2, %v6072_v35, 0.0 }
0x1df1   :  { %5094 = vadd.xlane.f32.xlu0 %v5093_v36 }
0x1e1b   :  { %v5938_v44 = vpop.f32.mrf.mxu0 }
0x1e1c   :  { %v4924_v39 = vadd.f32 %v5938_v44, %v4509_v37 }
0x1e1d   :  { %v4914_v40 = vpop.f32.mrf.mxu0 }
0x1e1e   :  { %v4923_v41 = vadd.f32 %v4914_v40, %v4504_v63 }
0x1e1f   :  { %v5077_v42 = vpop.f32.mrf.mxu0 }
0x1e20   :  { %v5084_v18 = vsel %vm362_vm2, %v5077_v42, -inf }
0x1e21   :  { %5085 = vmax.xlane.f32.xlu1 %v5084_v18  ;;  %v5948_v43 = vpop.f32.mrf.mxu0 }
0x1e32   :  { %5103 = vrot.lane.b32.xlu1 %v6262_v29, %s6182_s25  ;;  %v3689_v29 = vld [vmem:[#allocation7 + $0x58] sm:$0xff] }
0x1e7a   :  { %v5095_v46 = vpop.xlane.xlu0 %5094 }
0x1e7b   :  { %6073 = vrcp.f32 %v5095_v46 }
0x1e88   :  { %v6074_v47 = vpop.eup %6073 }
0x1e89   :  { %v5101_v51 = vmul.f32 %v6074_v47, %v6072_v35 }
0x1eaa   :  { %v5086_v45 = vpop.xlane.xlu1 %5085 }
0x1eab   :  { %v5088_v48 = vsub.f32 %v5077_v42, %v5086_v45 }
0x1ead   :  { %v5091_v49 = vmul.f32 1.442695, %v5088_v48 }
0x1eae   :  { %v5104_v50 = vpop.permute.xlu1 %5103 }
0x1eaf   :  { %6075 = vpow2.f32 %v5091_v49  ;;  %5950 = vmatpush3.msra.mxu1 %v5104_v50 }
0x1eb0   :  { %5952 = vmatmul.mubr.msk.f32.vlgmr.msra.gmra.mxu1 %vm362_vm2, %v5101_v51  ;;  %5959 = vmatprep.subr.mxu1 %v3689_v29 }
0x1eb1   :  { %5960 = vmatpush3.msra.mxu1 %v3689_v29 }
0x1ebc   :  { %v6076_v59 = vpop.eup %6075 }
0x1ebd   :  { %v5096_v52 = vsel %vm362_vm2, %v6076_v59, 0.0 }
0x1ebe   :  { %5097 = vadd.xlane.f32.xlu0 %v5096_v52 }
0x1ed4   :  { %5179 = vrot.lane.b32.xlu0 %v6265_v31, %s6182_s25 }
0x1f47   :  { %v5098_v20 = vpop.xlane.xlu0 %5097 }
0x1f48   :  { %6077 = vrcp.f32 %v5098_v20 }
0x1f4b   :  { %v5180_v53 = vpop.permute.xlu0 %5179 }
0x1f4c   :  { %5955 = vmatpush3.msra.mxu0 %v5180_v53 }
0x1f55   :  { %v6078_v19 = vpop.eup %6077 }
0x1f56   :  { %v5102_v54 = vmul.f32 %v6078_v19, %v6076_v59 }
0x1f58   :  { %5957 = vmatmul.mubr.msk.f32.vlgmr.msra.gmra.mxu0 %vm362_vm2, %v5102_v54 }
0x1f70   :  { %v5175_v55 = vpop.f32.mrf.mxu1 }
0x1f71   :  { %5961 = vmatprep.mubr.msk.f32.mxu1 %vm362_vm2, %v5175_v55 }
0x1f72   :  { %v5953_v56 = vpop.f32.mrf.mxu1 }
0x2018   :  { %v5251_v57 = vpop.f32.mrf.mxu0 }
0x2019   :  { %5962 = vmatmul.mubr.msk.f32.vlgmr.msra.gmra.mxu1 %vm362_vm2, %v5251_v57 }
0x201a   :  { %v5958_v58 = vpop.f32.mrf.mxu0 }
0x20d9   :  { %v5963_v31 = vpop.f32.mrf.mxu1 }
0x20da   :  { %v5337_v61 = vadd.f32 %v5963_v31, %v4924_v39 }
0x20db   :  { %v5327_v34 = vpop.f32.mrf.mxu1 }
0x20dc   :  { %v5347_v62 = vadd.f32 %v5480_v60, %v5337_v61  ;;  %v5336_v24 = vadd.f32 %v5327_v34, %v4923_v41 }
0x20de   :  { %5350 = vst.msk [vmem:[#allocation8 + $0x28] sm:$0xff] %vm79_vm0, %v5347_v62  ;;  %v5346_v0 = vadd.f32 %v5480_v60, %v5336_v24 }
0x20e0   :  { %5349 = vst.msk [vmem:[#allocation8 + $0x10] sm:$0xff] %vm79_vm0, %v5346_v0 }
0x20e1   :  { %6150 = shalt.err (!%p6147_p5)
}
0x20e2   :  { %5362 = dma.vmem_to_hbm [thread:$0]  %s5357_s7, 768, %s6783_s5, [#allocation4], %s6167_s23, %s6167_s23, %s6168_s24  }
0x20e3   :  { %6163 = dma.done.wait [#allocation4], 768  }
0x20e4   :  { %6164 = vsyncadd [#allocation4], 4294966528 }
0x20e5   :  { %5366 = vsyncpa [#allocation3], 1 }
0x20e6   :  { %5367 = vsyncpa [#allocation6], 1 }
0x20e7   :  { %5368 = vsyncpa [#allocation4], 1 }

</bundles_post_ra>
